<compile_context>
chip_gen: v6e
topology: v6e:2x2x1
jax: 0.10.0
libtpu: 0.0.40
codegen_flags: <defaults>
</compile_context>

<pallas_src>
import math
import functools

import jax
import jax.numpy as jnp
import numpy as np
from jax.experimental import pallas as pl
from jax.experimental.pallas import tpu as pltpu


# ---------------------------------------------------------------------------
# Fused multi-head-attention kernel (one grid step == one batch element)
# ---------------------------------------------------------------------------
def _mha_fused_kernel(
    x1_ref,        # (1, L, E)   query input, this batch
    x2_ref,        # (1, S, E)   key/value input, this batch
    wqT_ref,       # (E, E)      pre-transposed Wq
    bq_ref,        # (1, E)
    wkvT_ref,      # (E, 2E)     pre-transposed [Wk | Wv]
    bkv_ref,       # (1, 2E)
    bias_kv_ref,   # (1, 2E)     [bias_k | bias_v]  (add_bias_kv=True)
    woT_ref,       # (E, E)      pre-transposed out_proj weight
    bo_ref,        # (1, E)
    out_ref,       # (1, L, E)   attention output block
    w_ref,         # (1, L, Sp_pad) head-averaged attention weights (lane-dense)
    kv_scratch,    # VMEM (Sp_pad, 2E) padded key/value buffer
    *,
    num_heads,
    head_dim,
    scale,
    s_kv,          # S   (original key/value length)
    sp,            # S+2 (with bias_kv and zero_attn tokens)
    sp_pad,        # S+2 padded up to a multiple of 128
    emb,           # E
):
    x_q = x1_ref[0]        # (L, E)
    x_kv = x2_ref[0]       # (S, E)

    # --- fused projections (weights already transposed -> feed MXU directly)
    q = jnp.dot(x_q, wqT_ref[...], preferred_element_type=jnp.float32) + bq_ref[...]
    kv = jnp.dot(x_kv, wkvT_ref[...], preferred_element_type=jnp.float32) + bkv_ref[...]

    # --- build padded (Sp_pad, 2E) key/value buffer:
    #     rows [0:S)  projected k/v, row S: bias_k/bias_v, row S+1: zeros
    #     (add_zero_attn), rows >= S+2: zero padding (masked in softmax).
    kv_scratch[...] = jnp.zeros_like(kv_scratch)
    kv_scratch[0:s_kv, :] = kv
    kv_scratch[pl.ds(s_kv, 1), :] = bias_kv_ref[...]

    kv_full = kv_scratch[...]          # (Sp_pad, 2E)
    k_full = kv_full[:, 0:emb]         # (Sp_pad, E)
    v_full = kv_full[:, emb:]          # (Sp_pad, E)

    L = q.shape[0]
    col = jax.lax.broadcasted_iota(jnp.int32, (L, sp_pad), 1)
    valid = col < sp
    neg_big = jnp.float32(-1e30)
    inv_h = jnp.float32(1.0 / num_heads)

    probs_sum = jnp.zeros((L, sp_pad), jnp.float32)
    ctx_parts = []
    for h in range(num_heads):          # static unroll (small H)
        lo = h * head_dim
        hi = lo + head_dim
        qh = q[:, lo:hi] * scale        # (L, D)
        kh = k_full[:, lo:hi]           # (Sp_pad, D)
        vh = v_full[:, lo:hi]           # (Sp_pad, D)

        # scores: contract last dims of both operands (no explicit transpose)
        s = jax.lax.dot_general(
            qh, kh, (((1,), (1,)), ((), ())),
            preferred_element_type=jnp.float32)          # (L, Sp_pad)
        s = jnp.where(valid, s, neg_big)

        m = jnp.max(s, axis=-1, keepdims=True)
        p = jnp.exp(s - m)
        denom = jnp.sum(p, axis=-1, keepdims=True)
        # EUP approximate reciprocal + one Newton step (f32-accurate)
        r = pl.reciprocal(denom, approx=True)
        r = r * (2.0 - denom * r)
        probs = p * r                                    # (L, Sp_pad)

        probs_sum = probs_sum + probs
        ctx_parts.append(
            jnp.dot(probs, vh, preferred_element_type=jnp.float32))  # (L, D)

    ctx = jnp.concatenate(ctx_parts, axis=1)             # (L, E)
    out = jnp.dot(ctx, woT_ref[...], preferred_element_type=jnp.float32) + bo_ref[...]

    out_ref[0] = out
    w_ref[0] = probs_sum * inv_h


# ---------------------------------------------------------------------------
# Full MultiheadAttention forward (add_bias_kv=True, add_zero_attn=True,
# dropout=0.0, bias=True, need_weights=True, average_attn_weights=True)
# ---------------------------------------------------------------------------
def mha_forward(x1, x2, params, num_heads):
    L, N, E = x1.shape
    S = x2.shape[0]
    D = E // num_heads
    Sp = S + 2
    Sp_pad = ((Sp + 127) // 128) * 128

    W = params["in_proj_weight"]        # (3E, E)
    B = params["in_proj_bias"]          # (3E,)

    # pre-transpose weights once (constants) -> no in-kernel relayout
    WqT = W[:E].T                        # (E, E)
    WkvT = W[E:].T                       # (E, 2E): columns [k | v]
    bq = B[:E].reshape(1, E)
    bkv = B[E:].reshape(1, 2 * E)
    bias_kv = jnp.concatenate(
        [params["bias_k"].reshape(1, E), params["bias_v"].reshape(1, E)], axis=1)
    WoT = params["out_proj_weight"].T    # (E, E)
    bo = params["out_proj_bias"].reshape(1, E)

    # batch-major activations: (seq, N, E) -> (N, seq, E)
    x1b = jnp.transpose(x1, (1, 0, 2))
    x2b = jnp.transpose(x2, (1, 0, 2))

    kernel = functools.partial(
        _mha_fused_kernel,
        num_heads=num_heads, head_dim=D, scale=1.0 / math.sqrt(D),
        s_kv=S, sp=Sp, sp_pad=Sp_pad, emb=E)

    const2d = lambda shape: pl.BlockSpec(shape, lambda b: (0, 0))

    out, w = pl.pallas_call(
        kernel,
        out_shape=(
            jax.ShapeDtypeStruct((N, L, E), jnp.float32),
            jax.ShapeDtypeStruct((N, L, Sp_pad), jnp.float32),
        ),
        grid_spec=pltpu.PrefetchScalarGridSpec(
            num_scalar_prefetch=0,
            grid=(N,),
            in_specs=[
                pl.BlockSpec((1, L, E), lambda b: (b, 0, 0)),   # x1 (per batch)
                pl.BlockSpec((1, S, E), lambda b: (b, 0, 0)),   # x2 (per batch)
                const2d((E, E)),        # WqT      (resident across grid)
                const2d((1, E)),        # bq
                const2d((E, 2 * E)),    # WkvT
                const2d((1, 2 * E)),    # bkv
                const2d((1, 2 * E)),    # bias_kv
                const2d((E, E)),        # WoT
                const2d((1, E)),        # bo
            ],
            out_specs=[
                pl.BlockSpec((1, L, E), lambda b: (b, 0, 0)),
                pl.BlockSpec((1, L, Sp_pad), lambda b: (b, 0, 0)),  # lane-dense
            ],
            scratch_shapes=[pltpu.VMEM((Sp_pad, 2 * E), jnp.float32)],
        ),
        compiler_params=pltpu.CompilerParams(
            dimension_semantics=("parallel",)),
    )(x1b, x2b, WqT, bq, WkvT, bkv, bias_kv, WoT, bo)

    attn_out = jnp.transpose(out, (1, 0, 2))   # (L, N, E)
    attn_weights = w[:, :, :Sp]                # (N, L, S+2)
    return attn_out, attn_weights


# ---------------------------------------------------------------------------
# Pure-JAX reference (correctness sanity check)
# ---------------------------------------------------------------------------
def mha_reference(x1, x2, params, num_heads):
    L, N, E = x1.shape
    S = x2.shape[0]
    D = E // num_heads
    W, B = params["in_proj_weight"], params["in_proj_bias"]
    q = x1 @ W[:E].T + B[:E]
    k = x2 @ W[E:2 * E].T + B[E:2 * E]
    v = x2 @ W[2 * E:].T + B[2 * E:]
    k = jnp.concatenate([k, jnp.broadcast_to(params["bias_k"], (1, N, E)),
                         jnp.zeros((1, N, E))], axis=0)
    v = jnp.concatenate([v, jnp.broadcast_to(params["bias_v"], (1, N, E)),
                         jnp.zeros((1, N, E))], axis=0)
    Sp = S + 2
    qh = q.reshape(L, N, num_heads, D).transpose(1, 2, 0, 3)
    kh = k.reshape(Sp, N, num_heads, D).transpose(1, 2, 0, 3)
    vh = v.reshape(Sp, N, num_heads, D).transpose(1, 2, 0, 3)
    s = jnp.einsum("nhld,nhsd->nhls", qh / math.sqrt(D), kh)
    p = jax.nn.softmax(s, axis=-1)
    ctx = jnp.einsum("nhls,nhsd->nhld", p, vh)
    ctx = ctx.transpose(2, 0, 1, 3).reshape(L, N, E)
    out = ctx @ params["out_proj_weight"].T + params["out_proj_bias"]
    return out, p.mean(axis=1)


def init_params(key, embed_dim):
    ks = jax.random.split(key, 6)
    s = 1.0 / math.sqrt(embed_dim)
    return {
        "in_proj_weight": jax.random.uniform(
            ks[0], (3 * embed_dim, embed_dim), jnp.float32, -s, s),
        "in_proj_bias": jax.random.uniform(ks[1], (3 * embed_dim,), jnp.float32, -s, s),
        "bias_k": jax.random.normal(ks[2], (1, 1, embed_dim), jnp.float32),
        "bias_v": jax.random.normal(ks[3], (1, 1, embed_dim), jnp.float32),
        "out_proj_weight": jax.random.uniform(
            ks[4], (embed_dim, embed_dim), jnp.float32, -s, s),
        "out_proj_bias": jnp.zeros((embed_dim,), jnp.float32),
    }


if __name__ == "__main__":
    # Small shapes consistent with the module's forward:
    #   x1 (query): (L, N, E), x2 (key/value): (S, N, E), E divisible by num_heads.
    L, S, N, E, H = 8, 16, 2, 32, 4

    key = jax.random.PRNGKey(0)
    k_x1, k_x2, k_p = jax.random.split(key, 3)
    x1 = jax.random.normal(k_x1, (L, N, E), jnp.float32)
    x2 = jax.random.normal(k_x2, (S, N, E), jnp.float32)
    params = init_params(k_p, E)

    v1, v2 = mha_forward(x1, x2, params, H)
    (v1, v2) = jax.block_until_ready((v1, v2))

    # sanity check against the pure-JAX reference
    r1, r2 = mha_reference(x1, x2, params, H)
    np.testing.assert_allclose(np.asarray(v1), np.asarray(r1), rtol=1e-4, atol=1e-4)
    np.testing.assert_allclose(np.asarray(v2), np.asarray(r2), rtol=1e-4, atol=1e-4)

    assert v1.shape == (L, N, E)
    assert v2.shape == (N, L, S + 2)
    print("KERNEL_OK")
</pallas_src>

<mosaic_0001>
module attributes {stable_mosaic.version = 11 : i64} {
  func.func @_mha_fused_kernel(%arg0: i32, %arg1: memref<1x8x32xf32, #tpu.memory_space<vmem>>, %arg2: memref<1x16x32xf32, #tpu.memory_space<vmem>>, %arg3: memref<32x32xf32, #tpu.memory_space<vmem>>, %arg4: memref<1x32xf32, #tpu.memory_space<vmem>>, %arg5: memref<32x64xf32, #tpu.memory_space<vmem>>, %arg6: memref<1x64xf32, #tpu.memory_space<vmem>>, %arg7: memref<1x64xf32, #tpu.memory_space<vmem>>, %arg8: memref<32x32xf32, #tpu.memory_space<vmem>>, %arg9: memref<1x32xf32, #tpu.memory_space<vmem>>, %arg10: memref<1x8x32xf32, #tpu.memory_space<vmem>>, %arg11: memref<1x8x128xf32, #tpu.memory_space<vmem>>, %arg12: memref<128x64xf32, #tpu.memory_space<vmem>>) attributes {dimension_semantics = [#tpu.dimension_semantics<parallel>], iteration_bounds = array<i64: 2>, scalar_prefetch = 0 : i64, scratch_operands = 1 : i64, tpu.core_type = #tpu.core_type<tc>, window_params = [{transform_indices = @transform_0, window_bounds = array<i64: 1, 8, 32>}, {transform_indices = @transform_1, window_bounds = array<i64: 1, 16, 32>}, {pipeline_mode = #tpu.pipeline_mode<synchronous>, transform_indices = @transform_2, window_bounds = array<i64: 32, 32>}, {pipeline_mode = #tpu.pipeline_mode<synchronous>, transform_indices = @transform_3, window_bounds = array<i64: 1, 32>}, {pipeline_mode = #tpu.pipeline_mode<synchronous>, transform_indices = @transform_4, window_bounds = array<i64: 32, 64>}, {pipeline_mode = #tpu.pipeline_mode<synchronous>, transform_indices = @transform_5, window_bounds = array<i64: 1, 64>}, {pipeline_mode = #tpu.pipeline_mode<synchronous>, transform_indices = @transform_6, window_bounds = array<i64: 1, 64>}, {pipeline_mode = #tpu.pipeline_mode<synchronous>, transform_indices = @transform_7, window_bounds = array<i64: 32, 32>}, {pipeline_mode = #tpu.pipeline_mode<synchronous>, transform_indices = @transform_8, window_bounds = array<i64: 1, 32>}, {transform_indices = @transform_9, window_bounds = array<i64: 1, 8, 32>}, {transform_indices = @transform_10, window_bounds = array<i64: 1, 8, 128>}]} {
    %c0 = arith.constant 0 : index
    %c0_0 = arith.constant 0 : index
    %c0_1 = arith.constant 0 : index
    %0 = vector.load %arg1[%c0, %c0_0, %c0_1] : memref<1x8x32xf32, #tpu.memory_space<vmem>>, vector<1x8x32xf32>
    %1 = vector.shape_cast %0 : vector<1x8x32xf32> to vector<8x32xf32>
    %c0_2 = arith.constant 0 : index
    %c0_3 = arith.constant 0 : index
    %c0_4 = arith.constant 0 : index
    %2 = vector.load %arg2[%c0_2, %c0_3, %c0_4] : memref<1x16x32xf32, #tpu.memory_space<vmem>>, vector<1x16x32xf32>
    %3 = vector.shape_cast %2 : vector<1x16x32xf32> to vector<16x32xf32>
    %c0_5 = arith.constant 0 : index
    %c0_6 = arith.constant 0 : index
    %4 = vector.load %arg3[%c0_5, %c0_6] : memref<32x32xf32, #tpu.memory_space<vmem>>, vector<32x32xf32>
    %cst = arith.constant dense<0.000000e+00> : vector<8x32xf32>
    %5 = tpu.matmul %1, %4, %cst {dimension_numbers = #tpu.dot_dimension_numbers<[1], [0], [0], [1], [0, 0, 1, 1], [], []>} : vector<8x32xf32>, vector<32x32xf32>, vector<8x32xf32> -> vector<8x32xf32>
    %c0_7 = arith.constant 0 : index
    %c0_8 = arith.constant 0 : index
    %6 = vector.load %arg4[%c0_7, %c0_8] : memref<1x32xf32, #tpu.memory_space<vmem>>, vector<1x32xf32>
    %7 = vector.broadcast %6 : vector<1x32xf32> to vector<8x32xf32>
    %8 = arith.addf %5, %7 : vector<8x32xf32>
    %c0_9 = arith.constant 0 : index
    %c0_10 = arith.constant 0 : index
    %9 = vector.load %arg5[%c0_9, %c0_10] : memref<32x64xf32, #tpu.memory_space<vmem>>, vector<32x64xf32>
    %cst_11 = arith.constant dense<0.000000e+00> : vector<16x64xf32>
    %10 = tpu.matmul %3, %9, %cst_11 {dimension_numbers = #tpu.dot_dimension_numbers<[1], [0], [0], [1], [0, 0, 1, 1], [], []>} : vector<16x32xf32>, vector<32x64xf32>, vector<16x64xf32> -> vector<16x64xf32>
    %c0_12 = arith.constant 0 : index
    %c0_13 = arith.constant 0 : index
    %11 = vector.load %arg6[%c0_12, %c0_13] : memref<1x64xf32, #tpu.memory_space<vmem>>, vector<1x64xf32>
    %12 = vector.broadcast %11 : vector<1x64xf32> to vector<16x64xf32>
    %13 = arith.addf %10, %12 : vector<16x64xf32>
    %cst_14 = arith.constant 0.000000e+00 : f32
    %14 = vector.broadcast %cst_14 : f32 to vector<128x64xf32>
    %c0_15 = arith.constant 0 : index
    %c0_16 = arith.constant 0 : index
    %15 = vector.load %arg12[%c0_15, %c0_16] : memref<128x64xf32, #tpu.memory_space<vmem>>, vector<128x64xf32>
    tpu.vector_store %arg12[%c0_15, %c0_16], %14 {strides = array<i32>} : memref<128x64xf32, #tpu.memory_space<vmem>>, vector<128x64xf32>,
    %c0_17 = arith.constant 0 : index
    %c0_18 = arith.constant 0 : index
    %16 = vector.load %arg12[%c0_17, %c0_18] : memref<128x64xf32, #tpu.memory_space<vmem>>, vector<16x64xf32>
    tpu.vector_store %arg12[%c0_17, %c0_18], %13 {strides = array<i32>} : memref<128x64xf32, #tpu.memory_space<vmem>>, vector<16x64xf32>,
    %c0_19 = arith.constant 0 : index
    %c0_20 = arith.constant 0 : index
    %17 = vector.load %arg7[%c0_19, %c0_20] : memref<1x64xf32, #tpu.memory_space<vmem>>, vector<1x64xf32>
    %c16 = arith.constant 16 : index
    %c0_21 = arith.constant 0 : index
    %18 = vector.load %arg12[%c16, %c0_21] : memref<128x64xf32, #tpu.memory_space<vmem>>, vector<1x64xf32>
    tpu.vector_store %arg12[%c16, %c0_21], %17 {strides = array<i32>} : memref<128x64xf32, #tpu.memory_space<vmem>>, vector<1x64xf32>,
    %c0_22 = arith.constant 0 : index
    %c0_23 = arith.constant 0 : index
    %19 = vector.load %arg12[%c0_22, %c0_23] : memref<128x64xf32, #tpu.memory_space<vmem>>, vector<128x64xf32>
    %20 = vector.extract_strided_slice %19 {offsets = [0, 0], sizes = [128, 32], strides = [1, 1]} : vector<128x64xf32> to vector<128x32xf32>
    %21 = vector.extract_strided_slice %19 {offsets = [0, 32], sizes = [128, 32], strides = [1, 1]} : vector<128x64xf32> to vector<128x32xf32>
    %22 = tpu.iota {dimensions = array<i32: 1>} : vector<8x128xi32>
    %c18_i32 = arith.constant 18 : i32
    %23 = vector.broadcast %c18_i32 : i32 to vector<8x128xi32>
    %24 = arith.cmpi slt, %22, %23 : vector<8x128xi32>
    %cst_24 = arith.constant 0.000000e+00 : f32
    %25 = vector.broadcast %cst_24 : f32 to vector<8x128xf32>
    %26 = vector.extract_strided_slice %8 {offsets = [0, 0], sizes = [8, 8], strides = [1, 1]} : vector<8x32xf32> to vector<8x8xf32>
    %cst_25 = arith.constant 0.353553385 : f32
    %27 = vector.broadcast %cst_25 : f32 to vector<8x8xf32>
    %28 = arith.mulf %26, %27 : vector<8x8xf32>
    %29 = vector.extract_strided_slice %20 {offsets = [0, 0], sizes = [128, 8], strides = [1, 1]} : vector<128x32xf32> to vector<128x8xf32>
    %30 = vector.extract_strided_slice %21 {offsets = [0, 0], sizes = [128, 8], strides = [1, 1]} : vector<128x32xf32> to vector<128x8xf32>
    %cst_26 = arith.constant dense<0.000000e+00> : vector<8x128xf32>
    %31 = tpu.matmul %28, %29, %cst_26 {dimension_numbers = #tpu.dot_dimension_numbers<[1], [1], [0], [0], [0, 0, 1, 0], [], []>} : vector<8x8xf32>, vector<128x8xf32>, vector<8x128xf32> -> vector<8x128xf32>
    %cst_27 = arith.constant -1.000000e+30 : f32
    %32 = vector.broadcast %cst_27 : f32 to vector<8x128xf32>
    %33 = arith.select %24, %31, %32 : vector<8x128xi1>, vector<8x128xf32>
    %cst_28 = arith.constant dense<0xFF800000> : vector<8xf32>
    %34 = vector.multi_reduction <maximumf>, %33, %cst_28 [1] : vector<8x128xf32> to vector<8xf32>
    %35 = vector.shape_cast %34 : vector<8xf32> to vector<8x1xf32>
    %36 = vector.broadcast %35 : vector<8x1xf32> to vector<8x128xf32>
    %37 = arith.subf %33, %36 : vector<8x128xf32>
    %38 = math.exp %37 : vector<8x128xf32>
    %cst_29 = arith.constant dense<0.000000e+00> : vector<8xf32>
    %39 = vector.multi_reduction <add>, %38, %cst_29 [1] : vector<8x128xf32> to vector<8xf32>
    %40 = vector.shape_cast %39 : vector<8xf32> to vector<8x1xf32>
    %41 = tpu.reciprocal %40 {approx = true} : vector<8x1xf32> -> vector<8x1xf32>
    %42 = arith.mulf %40, %41 : vector<8x1xf32>
    %cst_30 = arith.constant 2.000000e+00 : f32
    %43 = vector.broadcast %cst_30 : f32 to vector<8x1xf32>
    %44 = arith.subf %43, %42 : vector<8x1xf32>
    %45 = arith.mulf %41, %44 : vector<8x1xf32>
    %46 = vector.broadcast %45 : vector<8x1xf32> to vector<8x128xf32>
    %47 = arith.mulf %38, %46 : vector<8x128xf32>
    %48 = arith.addf %25, %47 : vector<8x128xf32>
    %cst_31 = arith.constant dense<0.000000e+00> : vector<8x8xf32>
    %49 = tpu.matmul %47, %30, %cst_31 {dimension_numbers = #tpu.dot_dimension_numbers<[1], [0], [0], [1], [0, 0, 1, 1], [], []>} : vector<8x128xf32>, vector<128x8xf32>, vector<8x8xf32> -> vector<8x8xf32>
    %50 = vector.extract_strided_slice %8 {offsets = [0, 8], sizes = [8, 8], strides = [1, 1]} : vector<8x32xf32> to vector<8x8xf32>
    %cst_32 = arith.constant 0.353553385 : f32
    %51 = vector.broadcast %cst_32 : f32 to vector<8x8xf32>
    %52 = arith.mulf %50, %51 : vector<8x8xf32>
    %53 = vector.extract_strided_slice %20 {offsets = [0, 8], sizes = [128, 8], strides = [1, 1]} : vector<128x32xf32> to vector<128x8xf32>
    %54 = vector.extract_strided_slice %21 {offsets = [0, 8], sizes = [128, 8], strides = [1, 1]} : vector<128x32xf32> to vector<128x8xf32>
    %cst_33 = arith.constant dense<0.000000e+00> : vector<8x128xf32>
    %55 = tpu.matmul %52, %53, %cst_33 {dimension_numbers = #tpu.dot_dimension_numbers<[1], [1], [0], [0], [0, 0, 1, 0], [], []>} : vector<8x8xf32>, vector<128x8xf32>, vector<8x128xf32> -> vector<8x128xf32>
    %cst_34 = arith.constant -1.000000e+30 : f32
    %56 = vector.broadcast %cst_34 : f32 to vector<8x128xf32>
    %57 = arith.select %24, %55, %56 : vector<8x128xi1>, vector<8x128xf32>
    %cst_35 = arith.constant dense<0xFF800000> : vector<8xf32>
    %58 = vector.multi_reduction <maximumf>, %57, %cst_35 [1] : vector<8x128xf32> to vector<8xf32>
    %59 = vector.shape_cast %58 : vector<8xf32> to vector<8x1xf32>
    %60 = vector.broadcast %59 : vector<8x1xf32> to vector<8x128xf32>
    %61 = arith.subf %57, %60 : vector<8x128xf32>
    %62 = math.exp %61 : vector<8x128xf32>
    %cst_36 = arith.constant dense<0.000000e+00> : vector<8xf32>
    %63 = vector.multi_reduction <add>, %62, %cst_36 [1] : vector<8x128xf32> to vector<8xf32>
    %64 = vector.shape_cast %63 : vector<8xf32> to vector<8x1xf32>
    %65 = tpu.reciprocal %64 {approx = true} : vector<8x1xf32> -> vector<8x1xf32>
    %66 = arith.mulf %64, %65 : vector<8x1xf32>
    %cst_37 = arith.constant 2.000000e+00 : f32
    %67 = vector.broadcast %cst_37 : f32 to vector<8x1xf32>
    %68 = arith.subf %67, %66 : vector<8x1xf32>
    %69 = arith.mulf %65, %68 : vector<8x1xf32>
    %70 = vector.broadcast %69 : vector<8x1xf32> to vector<8x128xf32>
    %71 = arith.mulf %62, %70 : vector<8x128xf32>
    %72 = arith.addf %48, %71 : vector<8x128xf32>
    %cst_38 = arith.constant dense<0.000000e+00> : vector<8x8xf32>
    %73 = tpu.matmul %71, %54, %cst_38 {dimension_numbers = #tpu.dot_dimension_numbers<[1], [0], [0], [1], [0, 0, 1, 1], [], []>} : vector<8x128xf32>, vector<128x8xf32>, vector<8x8xf32> -> vector<8x8xf32>
    %74 = vector.extract_strided_slice %8 {offsets = [0, 16], sizes = [8, 8], strides = [1, 1]} : vector<8x32xf32> to vector<8x8xf32>
    %cst_39 = arith.constant 0.353553385 : f32
    %75 = vector.broadcast %cst_39 : f32 to vector<8x8xf32>
    %76 = arith.mulf %74, %75 : vector<8x8xf32>
    %77 = vector.extract_strided_slice %20 {offsets = [0, 16], sizes = [128, 8], strides = [1, 1]} : vector<128x32xf32> to vector<128x8xf32>
    %78 = vector.extract_strided_slice %21 {offsets = [0, 16], sizes = [128, 8], strides = [1, 1]} : vector<128x32xf32> to vector<128x8xf32>
    %cst_40 = arith.constant dense<0.000000e+00> : vector<8x128xf32>
    %79 = tpu.matmul %76, %77, %cst_40 {dimension_numbers = #tpu.dot_dimension_numbers<[1], [1], [0], [0], [0, 0, 1, 0], [], []>} : vector<8x8xf32>, vector<128x8xf32>, vector<8x128xf32> -> vector<8x128xf32>
    %cst_41 = arith.constant -1.000000e+30 : f32
    %80 = vector.broadcast %cst_41 : f32 to vector<8x128xf32>
    %81 = arith.select %24, %79, %80 : vector<8x128xi1>, vector<8x128xf32>
    %cst_42 = arith.constant dense<0xFF800000> : vector<8xf32>
    %82 = vector.multi_reduction <maximumf>, %81, %cst_42 [1] : vector<8x128xf32> to vector<8xf32>
    %83 = vector.shape_cast %82 : vector<8xf32> to vector<8x1xf32>
    %84 = vector.broadcast %83 : vector<8x1xf32> to vector<8x128xf32>
    %85 = arith.subf %81, %84 : vector<8x128xf32>
    %86 = math.exp %85 : vector<8x128xf32>
    %cst_43 = arith.constant dense<0.000000e+00> : vector<8xf32>
    %87 = vector.multi_reduction <add>, %86, %cst_43 [1] : vector<8x128xf32> to vector<8xf32>
    %88 = vector.shape_cast %87 : vector<8xf32> to vector<8x1xf32>
    %89 = tpu.reciprocal %88 {approx = true} : vector<8x1xf32> -> vector<8x1xf32>
    %90 = arith.mulf %88, %89 : vector<8x1xf32>
    %cst_44 = arith.constant 2.000000e+00 : f32
    %91 = vector.broadcast %cst_44 : f32 to vector<8x1xf32>
    %92 = arith.subf %91, %90 : vector<8x1xf32>
    %93 = arith.mulf %89, %92 : vector<8x1xf32>
    %94 = vector.broadcast %93 : vector<8x1xf32> to vector<8x128xf32>
    %95 = arith.mulf %86, %94 : vector<8x128xf32>
    %96 = arith.addf %72, %95 : vector<8x128xf32>
    %cst_45 = arith.constant dense<0.000000e+00> : vector<8x8xf32>
    %97 = tpu.matmul %95, %78, %cst_45 {dimension_numbers = #tpu.dot_dimension_numbers<[1], [0], [0], [1], [0, 0, 1, 1], [], []>} : vector<8x128xf32>, vector<128x8xf32>, vector<8x8xf32> -> vector<8x8xf32>
    %98 = vector.extract_strided_slice %8 {offsets = [0, 24], sizes = [8, 8], strides = [1, 1]} : vector<8x32xf32> to vector<8x8xf32>
    %cst_46 = arith.constant 0.353553385 : f32
    %99 = vector.broadcast %cst_46 : f32 to vector<8x8xf32>
    %100 = arith.mulf %98, %99 : vector<8x8xf32>
    %101 = vector.extract_strided_slice %20 {offsets = [0, 24], sizes = [128, 8], strides = [1, 1]} : vector<128x32xf32> to vector<128x8xf32>
    %102 = vector.extract_strided_slice %21 {offsets = [0, 24], sizes = [128, 8], strides = [1, 1]} : vector<128x32xf32> to vector<128x8xf32>
    %cst_47 = arith.constant dense<0.000000e+00> : vector<8x128xf32>
    %103 = tpu.matmul %100, %101, %cst_47 {dimension_numbers = #tpu.dot_dimension_numbers<[1], [1], [0], [0], [0, 0, 1, 0], [], []>} : vector<8x8xf32>, vector<128x8xf32>, vector<8x128xf32> -> vector<8x128xf32>
    %cst_48 = arith.constant -1.000000e+30 : f32
    %104 = vector.broadcast %cst_48 : f32 to vector<8x128xf32>
    %105 = arith.select %24, %103, %104 : vector<8x128xi1>, vector<8x128xf32>
    %cst_49 = arith.constant dense<0xFF800000> : vector<8xf32>
    %106 = vector.multi_reduction <maximumf>, %105, %cst_49 [1] : vector<8x128xf32> to vector<8xf32>
    %107 = vector.shape_cast %106 : vector<8xf32> to vector<8x1xf32>
    %108 = vector.broadcast %107 : vector<8x1xf32> to vector<8x128xf32>
    %109 = arith.subf %105, %108 : vector<8x128xf32>
    %110 = math.exp %109 : vector<8x128xf32>
    %cst_50 = arith.constant dense<0.000000e+00> : vector<8xf32>
    %111 = vector.multi_reduction <add>, %110, %cst_50 [1] : vector<8x128xf32> to vector<8xf32>
    %112 = vector.shape_cast %111 : vector<8xf32> to vector<8x1xf32>
    %113 = tpu.reciprocal %112 {approx = true} : vector<8x1xf32> -> vector<8x1xf32>
    %114 = arith.mulf %112, %113 : vector<8x1xf32>
    %cst_51 = arith.constant 2.000000e+00 : f32
    %115 = vector.broadcast %cst_51 : f32 to vector<8x1xf32>
    %116 = arith.subf %115, %114 : vector<8x1xf32>
    %117 = arith.mulf %113, %116 : vector<8x1xf32>
    %118 = vector.broadcast %117 : vector<8x1xf32> to vector<8x128xf32>
    %119 = arith.mulf %110, %118 : vector<8x128xf32>
    %120 = arith.addf %96, %119 : vector<8x128xf32>
    %cst_52 = arith.constant dense<0.000000e+00> : vector<8x8xf32>
    %121 = tpu.matmul %119, %102, %cst_52 {dimension_numbers = #tpu.dot_dimension_numbers<[1], [0], [0], [1], [0, 0, 1, 1], [], []>} : vector<8x128xf32>, vector<128x8xf32>, vector<8x8xf32> -> vector<8x8xf32>
    %122 = tpu.concatenate %49, %73, %97, %121 in 1 : vector<8x8xf32>, vector<8x8xf32>, vector<8x8xf32>, vector<8x8xf32> -> vector<8x32xf32>
    %c0_53 = arith.constant 0 : index
    %c0_54 = arith.constant 0 : index
    %123 = vector.load %arg8[%c0_53, %c0_54] : memref<32x32xf32, #tpu.memory_space<vmem>>, vector<32x32xf32>
    %cst_55 = arith.constant dense<0.000000e+00> : vector<8x32xf32>
    %124 = tpu.matmul %122, %123, %cst_55 {dimension_numbers = #tpu.dot_dimension_numbers<[1], [0], [0], [1], [0, 0, 1, 1], [], []>} : vector<8x32xf32>, vector<32x32xf32>, vector<8x32xf32> -> vector<8x32xf32>
    %c0_56 = arith.constant 0 : index
    %c0_57 = arith.constant 0 : index
    %125 = vector.load %arg9[%c0_56, %c0_57] : memref<1x32xf32, #tpu.memory_space<vmem>>, vector<1x32xf32>
    %126 = vector.broadcast %125 : vector<1x32xf32> to vector<8x32xf32>
    %127 = arith.addf %124, %126 : vector<8x32xf32>
    %c0_58 = arith.constant 0 : index
    %c0_59 = arith.constant 0 : index
    %c0_60 = arith.constant 0 : index
    %128 = vector.load %arg10[%c0_58, %c0_59, %c0_60] : memref<1x8x32xf32, #tpu.memory_space<vmem>>, vector<1x8x32xf32>
    %129 = vector.shape_cast %128 : vector<1x8x32xf32> to vector<8x32xf32>
    %130 = vector.shape_cast %127 : vector<8x32xf32> to vector<1x8x32xf32>
    tpu.vector_store %arg10[%c0_58, %c0_59, %c0_60], %130 {strides = array<i32>} : memref<1x8x32xf32, #tpu.memory_space<vmem>>, vector<1x8x32xf32>,
    %cst_61 = arith.constant 2.500000e-01 : f32
    %131 = vector.broadcast %cst_61 : f32 to vector<8x128xf32>
    %132 = arith.mulf %120, %131 : vector<8x128xf32>
    %c0_62 = arith.constant 0 : index
    %c0_63 = arith.constant 0 : index
    %c0_64 = arith.constant 0 : index
    %133 = vector.load %arg11[%c0_62, %c0_63, %c0_64] : memref<1x8x128xf32, #tpu.memory_space<vmem>>, vector<1x8x128xf32>
    %134 = vector.shape_cast %133 : vector<1x8x128xf32> to vector<8x128xf32>
    %135 = vector.shape_cast %132 : vector<8x128xf32> to vector<1x8x128xf32>
    tpu.vector_store %arg11[%c0_62, %c0_63, %c0_64], %135 {strides = array<i32>} : memref<1x8x128xf32, #tpu.memory_space<vmem>>, vector<1x8x128xf32>,
    return
  }
  func.func @transform_0(%arg0: i32) -> (i32, i32, i32) {
    %c0_i32 = arith.constant 0 : i32
    %c0_i32_0 = arith.constant 0 : i32
    %c0_i32_1 = arith.constant 0 : i32
    return %arg0, %c0_i32, %c0_i32_0 : i32, i32, i32
  }
  func.func @transform_1(%arg0: i32) -> (i32, i32, i32) {
    %c0_i32 = arith.constant 0 : i32
    %c0_i32_0 = arith.constant 0 : i32
    %c0_i32_1 = arith.constant 0 : i32
    return %arg0, %c0_i32, %c0_i32_0 : i32, i32, i32
  }
  func.func @transform_2(%arg0: i32) -> (i32, i32) {
    %c0_i32 = arith.constant 0 : i32
    %c0_i32_0 = arith.constant 0 : i32
    %c0_i32_1 = arith.constant 0 : i32
    return %c0_i32, %c0_i32_0 : i32, i32
  }
  func.func @transform_3(%arg0: i32) -> (i32, i32) {
    %c0_i32 = arith.constant 0 : i32
    %c0_i32_0 = arith.constant 0 : i32
    %c0_i32_1 = arith.constant 0 : i32
    return %c0_i32, %c0_i32_0 : i32, i32
  }
  func.func @transform_4(%arg0: i32) -> (i32, i32) {
    %c0_i32 = arith.constant 0 : i32
    %c0_i32_0 = arith.constant 0 : i32
    %c0_i32_1 = arith.constant 0 : i32
    return %c0_i32, %c0_i32_0 : i32, i32
  }
  func.func @transform_5(%arg0: i32) -> (i32, i32) {
    %c0_i32 = arith.constant 0 : i32
    %c0_i32_0 = arith.constant 0 : i32
    %c0_i32_1 = arith.constant 0 : i32
    return %c0_i32, %c0_i32_0 : i32, i32
  }
  func.func @transform_6(%arg0: i32) -> (i32, i32) {
    %c0_i32 = arith.constant 0 : i32
    %c0_i32_0 = arith.constant 0 : i32
    %c0_i32_1 = arith.constant 0 : i32
    return %c0_i32, %c0_i32_0 : i32, i32
  }
  func.func @transform_7(%arg0: i32) -> (i32, i32) {
    %c0_i32 = arith.constant 0 : i32
    %c0_i32_0 = arith.constant 0 : i32
    %c0_i32_1 = arith.constant 0 : i32
    return %c0_i32, %c0_i32_0 : i32, i32
  }
  func.func @transform_8(%arg0: i32) -> (i32, i32) {
    %c0_i32 = arith.constant 0 : i32
    %c0_i32_0 = arith.constant 0 : i32
    %c0_i32_1 = arith.constant 0 : i32
    return %c0_i32, %c0_i32_0 : i32, i32
  }
  func.func @transform_9(%arg0: i32) -> (i32, i32, i32) {
    %c0_i32 = arith.constant 0 : i32
    %c0_i32_0 = arith.constant 0 : i32
    %c0_i32_1 = arith.constant 0 : i32
    return %arg0, %c0_i32, %c0_i32_0 : i32, i32, i32
  }
  func.func @transform_10(%arg0: i32) -> (i32, i32, i32) {
    %c0_i32 = arith.constant 0 : i32
    %c0_i32_0 = arith.constant 0 : i32
    %c0_i32_1 = arith.constant 0 : i32
    return %arg0, %c0_i32, %c0_i32_0 : i32, i32, i32
  }
}

</mosaic_0001>

<bundles_post_ra>
// kernel: tpu_custom_call.1
= control target key start
LH: loop header
LB: loop body
LE: loop exit
PB: predicated region body
PF: predicated region fallthrough
CT: control target
= control target key end

     0   :  { %s3907_s0 = inlined_call_operand.hbm [shape: f32[2,8,32], index: 0, kind: input, shape index: {}]   ;;  %s3908_s1 = inlined_call_operand.hbm [shape: f32[2,16,32], index: 1, kind: input, shape index: {}]   ;;  %s3909_s2 = inlined_call_operand.hbm [shape: f32[32,32], index: 2, kind: input, shape index: {}]   ;;  %s3910_s3 = inlined_call_operand.vmem [shape: f32[1,32], index: 3, kind: input, shape index: {}]   ;;  %s3911_s4 = inlined_call_operand.hbm [shape: f32[32,64], index: 4, kind: input, shape index: {}]   ;;  %s3912_s5 = inlined_call_operand.vmem [shape: f32[1,64], index: 5, kind: input, shape index: {}]   ;;  %s3913_s6 = inlined_call_operand.vmem [shape: f32[1,64], index: 6, kind: input, shape index: {}]   ;;  %s3914_s7 = inlined_call_operand.hbm [shape: f32[32,32], index: 7, kind: input, shape index: {}]   ;;  %s3915_s8 = inlined_call_operand.vmem [shape: f32[1,32], index: 8, kind: input, shape index: {}]   ;;  %s3916_s9 = inlined_call_operand.hbm [shape: f32[2,8,32], index: 9, kind: output, shape index: {0}]   ;;  %s3917_s10 = inlined_call_operand.hbm [shape: f32[2,8,128], index: 10, kind: output, shape index: {1}]  }
   0x1   :  { %3925 = sst [smem:[#allocation23_spill]] %s3909_s2 }
   0x2   :  { %3926 = sst [smem:[#allocation24_spill]] %s3911_s4 }
   0x3   :  { %3927 = sst [smem:[#allocation25_spill]] %s3914_s7 }
   0x4   :  { %16 = vsyncpa [#allocation4], 0 }
   0x5   :  { %18 = vsyncpa [#allocation4 + $0x1], 0 }
   0x6   :  { %19 = vsyncpa [#allocation7], 0 }
   0x7   :  { %21 = vsyncpa [#allocation7 + $0x1], 0 }
   0x8   :  { %22 = vsyncpa [#allocation10], 0 }
   0x9   :  { %23 = vsyncpa [#allocation5], 0 }
   0xa   :  { %25 = vsyncpa [#allocation5 + $0x1], 0 }
   0xb   :  { %26 = vsyncpa [#allocation14], 0 }
   0xc   :  { %28 = vsyncpa [#allocation14 + $0x1], 0  ;;  %s3055_s13 = smov 0   ;;  %s3057_s14 = smov 0  }
   0xd   :  { %s3059_s15 = smov 0   ;;  %s3061_s16 = smov 0  }
   0xe LB: > { %3928 = sst [smem:[#allocation21_spill]] %s2973_s15  ;;  %s3076_s17 = sadd.s32 4294967295, %s2977_s16   ;;  %s2977_s16 = sphi %s3061_s16, %s3954_s16   ;;  %s2973_s15 = sphi %s3059_s15, %s3951_s15   ;;  %s2969_s14 = sphi %s3057_s14, %s3953_s14   ;;  %s2965_s13 = sphi %s3055_s13, %s3952_s13  }
   0xf   : > { %s2044_s18 = sadd.s32 4294967294, %s2977_s16   ;;  %p54_p0 = scmp.ne.s32.totalorder %s2969_s14, %s2965_s13 }
  0x10   : > { %p3918_p1 = scmp.eq.s32.totalorder %s3076_s17, 0  ;;  %p251_p2 = scmp.eq.s32.totalorder %s3076_s17, 1 }
  0x11   : > { %p257_p3 = scmp.eq.s32.totalorder %s2044_s18, 1  ;;  %p2045_p5 = scmp.ge.s32.totalorder %s2977_s16, 1 }
  0x12   : > { %p3085_p4 = por %p3918_p1, %p54_p0  ;;  %p290_p7 = scmp.lt.s32.totalorder %s2977_s16, 3 }
  0x13   : > { %p3090_p6 = por %p257_p3, %p54_p0  ;;  %s2979_s22 = smov [#allocation8]  }
  0x14   : > { %s3929_s19 = scalar_select %p3085_p4, 1, 0 }
  0x15   : > { %s3930_s20 = scalar_select %p3090_p6, 1, 0 }
  0x16   : > { %p3095_p8 = pnand %p2045_p5, %p290_p7  ;;  %s302_s23 = sshll.u32 %s2979_s22, 4  ;;  %s303_s23 = int_to_ptr.vmem [resolvable:$true] %s302_s23 }
  0x17   : > { %s2980_s25 = smov [#allocation9]   ;;  %s2981_s27 = smov [#allocation11]  }
  0x18   : > { %s3931_s21 = scalar_select %p3095_p8, 1, 0 }
  0x19   : > { %p2630_p9 = pneg %p3095_p8  ;;  %s318_s26 = sshll.u32 %s2980_s25, 4  ;;  %s319_s26 = int_to_ptr.vmem [resolvable:$true] %s318_s26 }
  0x1a   : > { %s337_s28 = sshll.u32 %s2981_s27, 4  ;;  %s2748_s29 = scalar_lea.vmem %s303_s23, 512  ;;  %s338_s28 = int_to_ptr.vmem [resolvable:$true] %s337_s28 }
  0x1b   : > { %p3104_p11 = pnand %p2630_p9, %p3918_p1  ;;  %p2749_p13 = scmp.ne.s32.totalorder %s303_s23, %s2748_s29 }
  0x1c   : > { %p2756_p5 = scmp.lt.s32.totalorder %s303_s23, %s303_s23  ;;  %p2757_p7 = scmp.lt.s32.totalorder %s2748_s29, %s2748_s29 }
  0x1d   : > { %p2739_p12 = pneg %p3104_p11 }
  0x1e   : > { %p2758_p9 = por %p2757_p7, %p2756_p5 }
  0x1f   : > { %p2751_p0 = pnand %p2749_p13, %p2739_p12 }
  0x21   : > { %p2752_p3 = pneg %p2751_p0 }
  0x23   : > { %p2759_p10 = pnand %p2758_p9, %p2752_p3 }
  0x25   : > { %2762 = shalt.err (!%p2759_p10)
}
  0x26   : > { %s3919_s30 = smov 128   ;;  %s3920_s11 = smov 8  }
  0x27   : > { %s3933_s2 = sld [smem:[#allocation23_spill]]  ;;  %s2774_s22 = scalar_lea.vmem %s319_s26, 512 }
  0x28   : > { %p2775_p13 = scmp.ne.s32.totalorder %s319_s26, %s2774_s22  ;;  %p2782_p3 = scmp.lt.s32.totalorder %s319_s26, %s319_s26 }
  0x29   : > { %p2783_p10 = scmp.lt.s32.totalorder %s2774_s22, %s2774_s22 }
  0x2a   : > { %p2777_p0 = pnand %p2775_p13, %p2739_p12 }
  0x2b   : > { %p2784_p7 = por %p2783_p10, %p2782_p3 }
  0x2c   : > { %p2778_p5 = pneg %p2777_p0 }
  0x2d   : > { %2633 = dma.hbm_to_vmem [thread:$0]  (!%p3104_p11), %s3933_s2, 512, %s303_s23, [#allocation7], %s3919_s30, %s3919_s30, %s3920_s11  }
  0x2e   : > { %p2785_p9 = pnand %p2784_p7, %p2778_p5 }
  0x30   : > { %2788 = shalt.err (!%p2785_p9)
}
  0x31   : > { %s3934_s4 = sld [smem:[#allocation24_spill]]  ;;  %s2800_s23 = scalar_lea.vmem %s338_s28, 512 }
  0x32   : > { %p2801_p1 = scmp.ne.s32.totalorder %s338_s28, %s2800_s23  ;;  %p2808_p3 = scmp.lt.s32.totalorder %s338_s28, %s338_s28 }
  0x33   : > { %p2809_p5 = scmp.lt.s32.totalorder %s2800_s23, %s2800_s23 }
  0x34   : > { %p2803_p13 = pnand %p2801_p1, %p2739_p12 }
  0x35   : > { %p2810_p10 = por %p2809_p5, %p2808_p3 }
  0x36   : > { %p2804_p0 = pneg %p2803_p13 }
  0x37   : > { %2636 = dma.hbm_to_vmem [thread:$0]  (!%p3104_p11), %s3934_s4, 512, %s319_s26, [#allocation10], %s3919_s30, %s3919_s30, %s3920_s11  }
  0x38   : > { %p2811_p7 = pnand %p2810_p10, %p2804_p0 }
  0x3a   : > { %2814 = shalt.err (!%p2811_p7)
}
  0x3b   : > { %s3935_s7 = sld [smem:[#allocation25_spill]]  ;;  %s3144_s26 = sadd.s32 1, %s2977_s16  }
  0x3c   : > { %s38_s24 = ssub.s32 %s2977_s16, %s3144_s26  ;;  %s41_s18 = sadd.s32 1, %s2973_s15 }
  0x3d   : > { %p39_p1 = scmp.eq.s32.totalorder %s38_s24, 0  ;;  %p48_p12 = scmp.ne.s32.totalorder %s2973_s15, %s2969_s14 }
  0x3e   : > { %p49_p9 = scmp.eq.s32.totalorder %s2977_s16, 0  ;;  %p2657_p13 = scmp.lt.s32.totalorder %s2977_s16, 2 }
  0x3f   : > { %s3154_s22 = scalar_select %p39_p1, %s2973_s15, %s41_s18  }
  0x40   : > { %p50_p0 = por %p49_p9, %p48_p12  ;;  %p3158_p3 = por %p251_p2, %p48_p12 }
  0x41   : > { %2639 = dma.hbm_to_vmem [thread:$0]  (!%p3104_p11), %s3935_s7, 512, %s338_s28, [#allocation10], %s3919_s30, %s3919_s30, %s3920_s11  }
  0x42   : > { %3936 = sst [smem:[#allocation22_spill]] %s3154_s22  ;;  %s3163_s27 = sand.u32 1, %s2973_s15  }
  0x43   : > { %s3937_s25 = scalar_select %p3158_p3, 1, 0 }
  0x44   : > { %s2051_s28 = sshll.u32 %s2977_s16, 7  ;;  %s2050_s23 = sshll.u32 %s3163_s27, 3 }
  0x45   : > { %s3170_s24 = scalar_lea.hbm %s3907_s0, %s2051_s28  ;;  %s358_s18 = scalar_lea.vmem [#allocation3], %s2050_s23 }
  0x46   : > { %s365_s30 = sshll.u32 %s358_s18, 4  ;;  %p3172_p2 = pnand %p2657_p13, %p50_p0  ;;  %s366_s30 = int_to_ptr.vmem [resolvable:$true] %s365_s30 }
  0x47   : > { %s2052_s2 = sshll.u32 %s3163_s27, 4  ;;  %s355_s4 = scalar_lea.sflag [#allocation4], %s3163_s27 }
  0x48   : > { %s2815_s7 = scalar_lea.hbm %s3170_s24, 128  ;;  %p2817_p5 = pneg %p3172_p2 }
  0x49   : > { %p2816_p11 = scmp.ne.s32.totalorder %s3170_s24, %s2815_s7  ;;  %s2820_s29 = scalar_lea.hbm %s3907_s0, 256 }
  0x4a   : > { %p2821_p1 = scmp.lt.s32.totalorder %s3170_s24, %s3907_s0  ;;  %p2822_p12 = scmp.lt.s32.totalorder %s2820_s29, %s2815_s7 }
  0x4b   : > { %p2818_p10 = pnand %p2817_p5, %p2816_p11 }
  0x4c   : > { %p2823_p9 = por %p2822_p12, %p2821_p1 }
  0x4d   : > { %p2819_p7 = pneg %p2818_p10 }
  0x4f   : > { %p2824_p13 = pnand %p2823_p9, %p2819_p7 }
  0x51   : > { %2827 = shalt.err (!%p2824_p13)
}
  0x52   : > { %s2828_s27 = scalar_lea.vmem %s366_s30, 128  ;;  %s2984_s22 = smov [#allocation3]  }
  0x53   : > { %p2829_p0 = scmp.ne.s32.totalorder %s366_s30, %s2828_s27  ;;  %s2833_s15 = sshll.u32 %s2984_s22, 4  ;;  %s2834_s15 = int_to_ptr.vmem [resolvable:$false] %s2833_s15 }
  0x54   : > { %s2835_s28 = scalar_lea.vmem %s2834_s15, 256  ;;  %p2836_p10 = scmp.lt.s32.totalorder %s366_s30, %s2834_s15 }
  0x55   : > { %p2831_p6 = pnand %p2829_p0, %p2817_p5  ;;  %p2837_p3 = scmp.lt.s32.totalorder %s2835_s28, %s2828_s27 }
  0x57   : > { %p2832_p11 = pneg %p2831_p6  ;;  %p2838_p4 = por %p2837_p3, %p2836_p10 }
  0x59   : > { %p2839_p8 = pnand %p2838_p4, %p2832_p11 }
  0x5b   : > { %2842 = shalt.err (!%p2839_p8)
}
  0x5c   : > { %2643 = dma.hbm_to_vmem [thread:$0]  (!%p3172_p2), %s3170_s24, 128, %s366_s30, %s355_s4  }
  0x5d   : > { %s376_s7 = scalar_lea.vmem [#allocation6], %s2052_s2  ;;  %s372_s29 = sand.u32 1, %s2977_s16  }
  0x5e   : > { %s383_s23 = sshll.u32 %s376_s7, 4  ;;  %s2144_s22 = sshll.u32 %s2977_s16, 8  ;;  %s3199_s23 = int_to_ptr.vmem [resolvable:$true] %s383_s23 }
  0x5f   : > { %s3205_s15 = scalar_lea.hbm %s3908_s1, %s2144_s22  ;;  %s373_s27 = scalar_lea.sflag [#allocation7], %s372_s29 }
  0x60   : > { %s2843_s28 = scalar_lea.hbm %s3205_s15, 256  ;;  %s2848_s30 = scalar_lea.hbm %s3908_s1, 512 }
  0x61   : > { %p2844_p4 = scmp.ne.s32.totalorder %s3205_s15, %s2843_s28  ;;  %p2849_p3 = scmp.lt.s32.totalorder %s3205_s15, %s3908_s1 }
  0x62   : > { %p2850_p7 = scmp.lt.s32.totalorder %s2848_s30, %s2843_s28 }
  0x63   : > { %p2846_p6 = pnand %p2844_p4, %p2817_p5 }
  0x64   : > { %p2851_p1 = por %p2850_p7, %p2849_p3 }
  0x65   : > { %p2847_p8 = pneg %p2846_p6 }
  0x67   : > { %p2852_p12 = pnand %p2851_p1, %p2847_p8 }
  0x69   : > { %2855 = shalt.err (!%p2852_p12)
}
  0x6a   : > { %s2856_s29 = scalar_lea.vmem %s3199_s23, 256  ;;  %s2985_s22 = smov [#allocation6]  }
  0x6b   : > { %p2857_p9 = scmp.ne.s32.totalorder %s3199_s23, %s2856_s29  ;;  %s2861_s12 = sshll.u32 %s2985_s22, 4  ;;  %s2862_s12 = int_to_ptr.vmem [resolvable:$false] %s2861_s12 }
  0x6c   : > { %s2863_s18 = scalar_lea.vmem %s2862_s12, 512  ;;  %p2864_p11 = scmp.lt.s32.totalorder %s3199_s23, %s2862_s12 }
  0x6d   : > { %p2859_p13 = pnand %p2857_p9, %p2817_p5  ;;  %p2865_p10 = scmp.lt.s32.totalorder %s2863_s18, %s2856_s29 }
  0x6f   : > { %p2860_p0 = pneg %p2859_p13  ;;  %p2866_p4 = por %p2865_p10, %p2864_p11 }
  0x71   : > { %p2867_p6 = pnand %p2866_p4, %p2860_p0 }
  0x73   : > { %2870 = shalt.err (!%p2867_p6)
}
  0x74   : > { %s3939_s28 = smov 8   ;;  %s3940_s2 = smov 128  }
  0x75   : > { %2646 = dma.hbm_to_vmem [thread:$0]  (!%p3172_p2), %s3205_s15, 256, %s3199_s23, %s373_s27, %s3940_s2, %s3940_s2, %s3939_s28  }
  0x76   : > { %p3941_p5 = scmp.ne.s32.totalorder %s3931_s21, 0 }
  0x77   : > { %s3235_s4 = sand.u32 (!%p3941_p5), 1, %s2969_s14   ;;  %p3942_p8 = scmp.ne.s32.totalorder (!%p3941_p5), %s3929_s19, 0 }
  0x78   : > { %395 = sbr.rel (%p3941_p5) target bundleno = 3104 (0xc20), region = 56  ;;  %s3238_s30 = sshll.u32 (!%p3941_p5), %s3235_s4, 3 }
  0x79   : > { %s398_s24 = scalar_lea.sflag (!%p3941_p5), [#allocation4], %s3235_s4  ;;  %s401_s11 = scalar_lea.vmem (!%p3941_p5), [#allocation3], %s3238_s30 }
  0x7d   : > { %2940 = dma.done.wait (%p3942_p8), %s398_s24, 128  }
  0x7e   : > { %2942 = vsyncadd (%p3942_p8), %s398_s24, 4294967168  ;;  %s406_s21 = sand.u32 1, %s3076_s17   ;;  %s2057_s23 = sshll.u32 %s3235_s4, 4 }
  0x7f   : > { %s407_s15 = scalar_lea.sflag [#allocation7], %s406_s21  ;;  %s3248_s27 = scalar_lea.vmem [#allocation6], %s2057_s23 }
  0x80   : > { %2944 = dma.done.wait (%p3942_p8), %s407_s15, 256  }
  0x81   : > { %2946 = vsyncadd (%p3942_p8), %s407_s15, 4294967040  ;;  %p3943_p2 = scmp.eq.s32.totalorder %s3076_s17, 0 }
  0x83   : > { %2948 = dma.done.wait (%p3943_p2), [#allocation7], 512   ;;  %p3944_p3 = pmov %p3943_p2 }
  0x84   : > { %p3945_p7 = pmov %p3943_p2 }
  0x85   : > { %2950 = vsyncadd (%p3944_p3), [#allocation7], 4294966784 }
  0x86   : > { %2952 = dma.done.wait (%p3945_p7), [#allocation10], 1024   ;;  %p3946_p1 = pmov %p3943_p2 }
  0x87   : > { %vm649_vm0 = vcmask 523264   ;;  %v2986_v0 = vmov 0.0   ;;  %vm2987_vm1 = vmmov 0   ;;  %vm483_vm2 = vcmask 261120   ;;  %v560_v1 = vld [vmem:[#allocation9 + $0x18] sm:$0xff]  ;;  %v559_v2 = vld [vmem:[#allocation9 + $0x10] sm:$0xff] }
  0x88   : > { %2954 = vsyncadd (%p3946_p1), [#allocation10], 4294966272  ;;  %2297 = vmatprep.subr.mxu0 %v2986_v0  ;;  %2305 = vmatprep.mubr.msk.f32.mxu0 %vm2987_vm1, %v2986_v0  ;;  %665 = vst.msk [vmem:[#allocation2 + $0x78] sm:$0xff] %vm649_vm0, %v2986_v0  ;;  %v470_v3 = vld [vmem:[%s3248_s27] sm:$0xff]  ;;  %v558_v4 = vld [vmem:[#allocation9 + $0x8] sm:$0xff]  ;;  %vm691_vm3 = vcmask 64512   ;;  %v687_v41 = vlaneseq }
  0x89   : > { %650 = vst.msk [vmem:[#allocation2] sm:$0xff] %vm649_vm0, %v2986_v0  ;;  %651 = vst.msk [vmem:[#allocation2 + $0x8] sm:$0xff] %vm649_vm0, %v2986_v0  ;;  %2308 = vmatprep.subr.mxu1 %v560_v1  ;;  %2316 = vmatprep.mubr.msk.f32.mxu1 %vm483_vm2, %v470_v3  ;;  %v475_v5 = vld [vmem:[#allocation8 + $0x18] sm:$0xff]  ;;  %v474_v6 = vld [vmem:[#allocation8 + $0x10] sm:$0xff]  ;;  %s2988_s19 = smov 96   ;;  %vm669_vm4 = vcmask 516096  }
  0x8a   : > { %652 = vst.msk [vmem:[#allocation2 + $0x10] sm:$0xff] %vm649_vm0, %v2986_v0  ;;  %653 = vst.msk [vmem:[#allocation2 + $0x18] sm:$0xff] %vm649_vm0, %v2986_v0  ;;  %2309 = vmatpush3.msra.mxu1 %v560_v1  ;;  %2298 = vmatpush3.msra.mxu0 %v475_v5  ;;  %v557_v7 = vld [vmem:[#allocation9] sm:$0xff]  ;;  %v473_v8 = vld [vmem:[#allocation8 + $0x8] sm:$0xff]  ;;  %s2989_s2 = smov 120   ;;  %v3452_v42 = vand.u32 127, %v687_v41 }
  0x8b   : > { %654 = vst.msk [vmem:[#allocation2 + $0x20] sm:$0xff] %vm649_vm0, %v2986_v0  ;;  %655 = vst.msk [vmem:[#allocation2 + $0x28] sm:$0xff] %vm649_vm0, %v2986_v0  ;;  %2310 = vmatprep.subr.mxu1 %v559_v2  ;;  %2299 = vmatprep.subr.mxu0 %v2986_v0  ;;  %v471_v9 = vld [vmem:[%s3248_s27 + $0x8] sm:$0xff]  ;;  %v472_v10 = vld [vmem:[#allocation8] sm:$0xff]  ;;  %s2990_s24 = smov 88   ;;  %s2992_s21 = smov 80  }
  0x8c   : > { %656 = vst.msk [vmem:[#allocation2 + $0x30] sm:$0xff] %vm649_vm0, %v2986_v0  ;;  %657 = vst.msk [vmem:[#allocation2 + $0x38] sm:$0xff] %vm649_vm0, %v2986_v0  ;;  %2311 = vmatpush3.msra.mxu1 %v559_v2  ;;  %2300 = vmatpush3.msra.mxu0 %v474_v6  ;;  %v469_v11 = vld [vmem:[%s401_s11] sm:$0xff]  ;;  %vm689_vm5 = vcmp.lt.s32.totalorder %v3452_v42, 18  ;;  %s2991_s11 = smov 112   ;;  %s2993_s23 = smov 104  }
  0x8d   : > { %658 = vst.msk [vmem:[#allocation2 + $0x40] sm:$0xff] %vm649_vm0, %v2986_v0  ;;  %659 = vst.msk [vmem:[#allocation2 + $0x48] sm:$0xff] %vm649_vm0, %v2986_v0  ;;  %2312 = vmatprep.subr.mxu1 %v558_v4  ;;  %2301 = vmatprep.subr.mxu0 %v2986_v0  ;;  %v668_v24 = vld [vmem:[%s3913_s6] sm:$0x1]  ;;  %s2994_s15 = smov 72   ;;  %s2995_s27 = smov 8  }
  0x8e   : > { %660 = vst.msk [vmem:[#allocation2 + $0x50] sm:$0xff] %vm649_vm0, %v2986_v0  ;;  %661 = vst.msk [vmem:[#allocation2 + $0x58] sm:$0xff] %vm649_vm0, %v2986_v0  ;;  %2313 = vmatpush3.msra.mxu1 %v558_v4  ;;  %2302 = vmatpush3.msra.mxu0 %v473_v8  ;;  %v2065_v29 = vld [vmem:[%s3912_s5] ss:$0 sm:$0xff]  ;;  %s468_s7 = scalar_lea.vmem [#allocation13], %s3238_s30  ;;  %s2997_s29 = smov 24  }
  0x8f   : > { %662 = vst.msk [vmem:[#allocation2 + $0x60] sm:$0xff] %vm649_vm0, %v2986_v0  ;;  %663 = vst.msk [vmem:[#allocation2 + $0x68] sm:$0xff] %vm649_vm0, %v2986_v0  ;;  %2314 = vmatprep.subr.mxu1 %v557_v7  ;;  %2303 = vmatprep.subr.mxu0 %v2986_v0  ;;  %v3305_v12 = vld [vmem:[#allocation2 + $0x78] sm:$0xff]  ;;  %v2063_v36 = vld [vmem:[%s3910_s3] ss:$0 sm:$0xff]  ;;  %vm1768_vm6 = vcmask 130048  }
  0x90   : > { %664 = vst.msk [vmem:[#allocation2 + $0x70] sm:$0xff] %vm649_vm0, %v2986_v0  ;;  %2315 = vmatpush3.msra.mxu1 %v557_v7  ;;  %2304 = vmatpush3.msra.mxu0 %v472_v10  ;;  %vm1770_vm7 = vcmask 195584   ;;  %s2140_s22 = sshll.u32 %s3076_s17, 7  ;;  %p3947_p9 = scmp.ne.s32.totalorder %s3937_s25, 0 }
  0x91   : > { %2317 = vmatmul.mubr.msk.f32.vlgmr.msra.gmra.mxu1 %vm483_vm2, %v471_v9  ;;  %2306 = vmatmul.mubr.msk.f32.vlgmr.msra.gmra.mxu0 %vm483_vm2, %v469_v11  ;;  %670 = vst.msk [vmem:[#allocation2 + $0x10] sm:$0x1] %vm669_vm4, %v668_v24  ;;  %v3394_v25 = vld [vmem:[#allocation2 + $0x18] sm:$0xff]  ;;  %s1889_s28 = scalar_lea.hbm %s3917_s10, %s2140_s22 }
  0x92   : > { %2319 = vmatprep.subr.mxu0 %v2986_v0  ;;  %857 = vrot.lane.b32.xlu1 %v3305_v12, %s2988_s19  ;;  %v3371_v21 = vld [vmem:[#allocation2 + $0x28] sm:$0xff]  ;;  %v3386_v23 = vld [vmem:[#allocation2 + $0x20] sm:$0xff] }
  0x93   : > { %2320 = vmatpush3.xpose.msk.msra.mxu0 %vm691_vm3, %v3305_v12  ;;  %2351 = vmatprep.mubr.msk.f32.mxu0 %vm2987_vm1, %v2986_v0  ;;  %v3364_v20 = vld [vmem:[#allocation2 + $0x38] sm:$0xff]  ;;  %v3378_v22 = vld [vmem:[#allocation2 + $0x30] sm:$0xff] }
  0x94   : > { %2321 = vmatprep.subr.mxu0 %v2986_v0  ;;  %2354 = vmatprep.subr.mxu1 %v2986_v0  ;;  %v3350_v18 = vld [vmem:[#allocation2 + $0x48] sm:$0xff]  ;;  %v3357_v19 = vld [vmem:[#allocation2 + $0x40] sm:$0xff] }
  0x95   : > { %2386 = vmatprep.mubr.msk.f32.mxu1 %vm2987_vm1, %v2986_v0  ;;  %v3336_v16 = vld [vmem:[#allocation2 + $0x58] sm:$0xff]  ;;  %v3343_v17 = vld [vmem:[#allocation2 + $0x50] sm:$0xff] }
  0x96   : > { %v3327_v14 = vld [vmem:[#allocation2 + $0x68] sm:$0xff]  ;;  %v3329_v15 = vld [vmem:[#allocation2 + $0x60] sm:$0xff] }
  0x97   : > { %v3315_v13 = vld [vmem:[#allocation2 + $0x70] sm:$0xff] }
  0x98   : > { %2322 = vmatpush3.xpose.msk.msra.mxu0 %vm691_vm3, %v3315_v13  ;;  %855 = vrot.lane.b32.xlu1 %v3315_v13, %s2988_s19  ;;  %v3401_v26 = vld [vmem:[#allocation2 + $0x10] sm:$0xff] }
  0x99   : > { %2323 = vmatprep.subr.mxu0 %v2986_v0 }
  0x9c   : > { %2324 = vmatpush3.xpose.msk.msra.mxu0 %vm691_vm3, %v3327_v14  ;;  %851 = vrot.lane.b32.xlu1 %v3329_v15, %s2988_s19 }
  0x9d   : > { %2325 = vmatprep.subr.mxu0 %v2986_v0 }
  0xa0   : > { %2326 = vmatpush3.xpose.msk.msra.mxu0 %vm691_vm3, %v3329_v15  ;;  %849 = vrot.lane.b32.xlu1 %v3336_v16, %s2988_s19 }
  0xa1   : > { %2327 = vmatprep.subr.mxu0 %v2986_v0 }
  0xa4   : > { %2328 = vmatpush3.xpose.msk.msra.mxu0 %vm691_vm3, %v3336_v16  ;;  %847 = vrot.lane.b32.xlu1 %v3343_v17, %s2988_s19 }
  0xa5   : > { %2329 = vmatprep.subr.mxu0 %v2986_v0 }
  0xa8   : > { %2330 = vmatpush3.xpose.msk.msra.mxu0 %vm691_vm3, %v3343_v17  ;;  %845 = vrot.lane.b32.xlu1 %v3350_v18, %s2988_s19 }
  0xa9   : > { %2331 = vmatprep.subr.mxu0 %v2986_v0 }
  0xac   : > { %2332 = vmatpush3.xpose.msk.msra.mxu0 %vm691_vm3, %v3350_v18  ;;  %843 = vrot.lane.b32.xlu1 %v3357_v19, %s2988_s19 }
  0xad   : > { %2333 = vmatprep.subr.mxu0 %v2986_v0 }
  0xb0   : > { %2334 = vmatpush3.xpose.msk.msra.mxu0 %vm691_vm3, %v3357_v19  ;;  %841 = vrot.lane.b32.xlu1 %v3364_v20, %s2988_s19 }
  0xb1   : > { %2335 = vmatprep.subr.mxu0 %v2986_v0 }
  0xb4   : > { %2336 = vmatpush3.xpose.msk.msra.mxu0 %vm691_vm3, %v3364_v20  ;;  %837 = vrot.lane.b32.xlu1 %v3371_v21, %s2988_s19 }
  0xb5   : > { %2337 = vmatprep.subr.mxu0 %v2986_v0 }
  0xb8   : > { %2338 = vmatpush3.xpose.msk.msra.mxu0 %vm691_vm3, %v3378_v22  ;;  %833 = vrot.lane.b32.xlu1 %v3394_v25, %s2988_s19 }
  0xb9   : > { %2339 = vmatprep.subr.mxu0 %v2986_v0 }
  0xbc   : > { %2340 = vmatpush3.xpose.msk.msra.mxu0 %vm691_vm3, %v3371_v21 }
  0xbd   : > { %2341 = vmatprep.subr.mxu0 %v2986_v0 }
  0xc0   : > { %2342 = vmatpush3.xpose.msk.msra.mxu0 %vm691_vm3, %v3386_v23 }
  0xc1   : > { %2343 = vmatprep.subr.mxu0 %v2986_v0 }
  0xc4   : > { %2344 = vmatpush3.xpose.msk.msra.mxu0 %vm691_vm3, %v3394_v25 }
  0xc5   : > { %2345 = vmatprep.subr.mxu0 %v2986_v0 }
  0xc8   : > { %2346 = vmatpush3.xpose.msk.msra.mxu0 %vm691_vm3, %v3401_v26 }
  0xc9   : > { %2347 = vmatprep.subr.mxu0 %v2986_v0 }
 0x104   : > { %v858_v27 = vpop.permute.xlu1 %857 }
 0x105   : > { %2355 = vmatpush3.msra.mxu1 %v858_v27 }
 0x106   : > { %2356 = vmatprep.subr.mxu1 %v2986_v0 }
 0x10a   : > { %v856_v28 = vpop.permute.xlu1 %855 }
 0x10b   : > { %2357 = vmatpush3.msra.mxu1 %v856_v28 }
 0x10c   : > { %2358 = vmatprep.subr.mxu1 %v2986_v0 }
 0x10e   : > { %v852_v46 = vpop.permute.xlu1 %851 }
 0x112   : > { %v850_v47 = vpop.permute.xlu1 %849 }
 0x116   : > { %v848_v48 = vpop.permute.xlu1 %847 }
 0x11a   : > { %v846_v49 = vpop.permute.xlu1 %845 }
 0x11e   : > { %v844_v54 = vpop.permute.xlu1 %843 }
 0x122   : > { %v842_v55 = vpop.permute.xlu1 %841 }
 0x126   : > { %v838_v58 = vpop.permute.xlu1 %837 }
 0x12a   : > { %v834_v60 = vpop.permute.xlu1 %833 }
 0x151   : > { %v2318_v30 = vpop.f32.mrf.mxu1  ;;  %v553_v32 = vpop.f32.mrf.mxu0 }
 0x152   : > { %v646_v31 = vadd.f32 %v2318_v30, %v2065_v29  ;;  %v554_v38 = vadd.f32 %v2063_v36, %v553_v32 }
 0x153   : > { %v640_v33 = vpop.f32.mrf.mxu1  ;;  %v2307_v35 = vpop.f32.mrf.mxu0 }
 0x154   : > { %667 = vst.msk [vmem:[#allocation2 + $0x8] sm:$0xff] %vm649_vm0, %v646_v31  ;;  %v641_v34 = vadd.f32 %v2065_v29, %v640_v33  ;;  %v3423_v39 = vmul.f32 0.35355338, %v554_v38 }
 0x156   : > { %666 = vst.msk [vmem:[#allocation2] sm:$0xff] %vm649_vm0, %v641_v34 }
 0x15b   : > { %v3416_v37 = vld [vmem:[#allocation2 + $0x8] sm:$0xff] }
 0x15c   : > { %829 = vrot.lane.b32.xlu1 %v3416_v37, %s2988_s19  ;;  %2348 = vmatpush3.xpose.msk.msra.mxu0 %vm691_vm3, %v3416_v37 }
 0x15d   : > { %2349 = vmatprep.subr.mxu0 %v2986_v0  ;;  %v3425_v40 = vld [vmem:[#allocation2] sm:$0xff] }
 0x160   : > { %977 = vrot.lane.b32.xlu1 %v3305_v12, %s2989_s2  ;;  %2350 = vmatpush3.xpose.msk.msra.mxu0 %vm691_vm3, %v3425_v40 }
 0x161   : > { %2424 = vmatprep.subr.mxu0 %v2986_v0 }
 0x163   : > { %2352 = vmatmul.mubr.msk.f32.vlgmr.msra.gmra.mxu0 %vm691_vm3, %v3423_v39 }
 0x164   : > { %973 = vrot.lane.b32.xlu1 %v3327_v14, %s2989_s2  ;;  %2456 = vmatprep.mubr.msk.f32.mxu0 %vm2987_vm1, %v2986_v0 }
 0x168   : > { %969 = vrot.lane.b32.xlu1 %v3336_v16, %s2989_s2 }
 0x16c   : > { %965 = vrot.lane.b32.xlu1 %v3350_v18, %s2989_s2 }
 0x170   : > { %961 = vrot.lane.b32.xlu1 %v3364_v20, %s2989_s2 }
 0x174   : > { %957 = vrot.lane.b32.xlu1 %v3371_v21, %s2989_s2 }
 0x178   : > { %953 = vrot.lane.b32.xlu1 %v3394_v25, %s2989_s2 }
 0x17c   : > { %949 = vrot.lane.b32.xlu1 %v3416_v37, %s2989_s2 }
 0x180   : > { %945 = vrot.lane.b32.xlu1 %v3423_v39, %s2989_s2 }
 0x184   : > { %1125 = vrot.lane.b32.xlu1 %v3315_v13, %s2990_s24 }
 0x188   : > { %1121 = vrot.lane.b32.xlu1 %v3329_v15, %s2990_s24 }
 0x18c   : > { %1117 = vrot.lane.b32.xlu1 %v3343_v17, %s2990_s24 }
 0x190   : > { %1113 = vrot.lane.b32.xlu1 %v3357_v19, %s2990_s24 }
 0x194   : > { %1109 = vrot.lane.b32.xlu1 %v3378_v22, %s2990_s24 }
 0x198   : > { %1105 = vrot.lane.b32.xlu1 %v3386_v23, %s2990_s24 }
 0x19c   : > { %1101 = vrot.lane.b32.xlu1 %v3401_v26, %s2990_s24 }
 0x1ce   : > { %v830_v63 = vpop.permute.xlu1 %829 }
 0x1d2   : > { %v978_v7 = vpop.permute.xlu1 %977 }
 0x1d6   : > { %v974_v9 = vpop.permute.xlu1 %973 }
 0x1da   : > { %v970_v11 = vpop.permute.xlu1 %969 }
 0x1de   : > { %v966_v27 = vpop.permute.xlu1 %965 }
 0x1e2   : > { %v962_v29 = vpop.permute.xlu1 %961 }
 0x1e6   : > { %v958_v31 = vpop.permute.xlu1 %957 }
 0x1ea   : > { %v954_v33 = vpop.permute.xlu1 %953 }
 0x1ee   : > { %v950_v35 = vpop.permute.xlu1 %949 }
 0x1f2   : > { %v946_v38 = vpop.permute.xlu1 %945 }
 0x223   : > { %v809_v43 = vpop.f32.mrf.mxu0 }
 0x224   : > { %v813_v44 = vsel %vm689_vm5, %v809_v43, -1e+30 }
 0x225   : > { %814 = vmax.xlane.f32.xlu0 %v813_v44  ;;  %v2353_v45 = vpop.f32.mrf.mxu0 }
 0x23b   : > { %853 = vrot.lane.b32.xlu0 %v3327_v14, %s2988_s19 }
 0x23f   : > { %839 = vrot.lane.b32.xlu0 %v3378_v22, %s2988_s19 }
 0x243   : > { %835 = vrot.lane.b32.xlu0 %v3386_v23, %s2988_s19 }
 0x2ae   : > { %v815_v50 = vpop.xlane.xlu0 %814 }
 0x2af   : > { %v816_v51 = vsub.f32 %v813_v44, %v815_v50 }
 0x2b1   : > { %v817_v52 = vmul.f32 1.442695, %v816_v51 }
 0x2b2   : > { %v854_v53 = vpop.permute.xlu0 %853 }
 0x2b3   : > { %2711 = vpow2.f32 %v817_v52  ;;  %2359 = vmatpush3.msra.mxu1 %v854_v53 }
 0x2b4   : > { %2360 = vmatprep.subr.mxu1 %v2986_v0 }
 0x2b5   : > { %2361 = vmatpush3.msra.mxu1 %v852_v46 }
 0x2b6   : > { %2362 = vmatprep.subr.mxu1 %v2986_v0  ;;  %v840_v56 = vpop.permute.xlu0 %839 }
 0x2b7   : > { %2363 = vmatpush3.msra.mxu1 %v850_v47  ;;  %v1126_v47 = vpop.permute.xlu1 %1125 }
 0x2b8   : > { %2364 = vmatprep.subr.mxu1 %v2986_v0 }
 0x2b9   : > { %2365 = vmatpush3.msra.mxu1 %v848_v48 }
 0x2ba   : > { %2366 = vmatprep.subr.mxu1 %v2986_v0  ;;  %v836_v59 = vpop.permute.xlu0 %835 }
 0x2bb   : > { %2367 = vmatpush3.msra.mxu1 %v846_v49  ;;  %v1122_v48 = vpop.permute.xlu1 %1121 }
 0x2bc   : > { %2368 = vmatprep.subr.mxu1 %v2986_v0 }
 0x2bd   : > { %2369 = vmatpush3.msra.mxu1 %v844_v54 }
 0x2be   : > { %2370 = vmatprep.subr.mxu1 %v2986_v0 }
 0x2bf   : > { %2371 = vmatpush3.msra.mxu1 %v842_v55  ;;  %v1118_v53 = vpop.permute.xlu1 %1117 }
 0x2c0   : > { %v2712_v57 = vpop.eup %2711  ;;  %2372 = vmatprep.subr.mxu1 %v2986_v0 }
 0x2c1   : > { %819 = vadd.xlane.f32.xlu0 %v2712_v57  ;;  %2373 = vmatpush3.msra.mxu1 %v840_v56 }
 0x2c2   : > { %2374 = vmatprep.subr.mxu1 %v2986_v0 }
 0x2c3   : > { %2375 = vmatpush3.msra.mxu1 %v838_v58  ;;  %v1114_v55 = vpop.permute.xlu1 %1113 }
 0x2c4   : > { %2376 = vmatprep.subr.mxu1 %v2986_v0 }
 0x2c5   : > { %2377 = vmatpush3.msra.mxu1 %v836_v59 }
 0x2c6   : > { %2378 = vmatprep.subr.mxu1 %v2986_v0 }
 0x2c7   : > { %2379 = vmatpush3.msra.mxu1 %v834_v60  ;;  %v1110_v58 = vpop.permute.xlu1 %1109 }
 0x2c8   : > { %2380 = vmatprep.subr.mxu1 %v2986_v0 }
 0x2d7   : > { %831 = vrot.lane.b32.xlu0 %v3401_v26, %s2988_s19 }
 0x2db   : > { %827 = vrot.lane.b32.xlu0 %v3425_v40, %s2988_s19  ;;  %s2996_s19 = smov 16  }
 0x2df   : > { %975 = vrot.lane.b32.xlu0 %v3315_v13, %s2989_s2 }
 0x2e3   : > { %971 = vrot.lane.b32.xlu0 %v3329_v15, %s2989_s2 }
 0x2e7   : > { %967 = vrot.lane.b32.xlu0 %v3343_v17, %s2989_s2 }
 0x2eb   : > { %963 = vrot.lane.b32.xlu0 %v3357_v19, %s2989_s2 }
 0x2ef   : > { %959 = vrot.lane.b32.xlu0 %v3378_v22, %s2989_s2 }
 0x2f3   : > { %955 = vrot.lane.b32.xlu0 %v3386_v23, %s2989_s2 }
 0x2f7   : > { %951 = vrot.lane.b32.xlu0 %v3401_v26, %s2989_s2 }
 0x2fb   : > { %947 = vrot.lane.b32.xlu0 %v3425_v40, %s2989_s2  ;;  %s1891_s2 = sshll.u32 %s468_s7, 4  ;;  %s1892_s2 = int_to_ptr.vmem [resolvable:$true] %s1891_s2 }
 0x34a   : > { %v820_v61 = vpop.xlane.xlu0 %819 }
 0x34b   : > { %2713 = vrcp.f32 %v820_v61 }
 0x34e   : > { %v832_v62 = vpop.permute.xlu0 %831 }
 0x34f   : > { %2381 = vmatpush3.msra.mxu1 %v832_v62 }
 0x350   : > { %2382 = vmatprep.subr.mxu1 %v2986_v0 }
 0x351   : > { %2383 = vmatpush3.msra.mxu1 %v830_v63 }
 0x352   : > { %2384 = vmatprep.subr.mxu1 %v2986_v0  ;;  %v828_v1 = vpop.permute.xlu0 %827 }
 0x353   : > { %2385 = vmatpush3.msra.mxu1 %v828_v1 }
 0x354   : > { %2389 = vmatprep.subr.mxu1 %v2986_v0 }
 0x356   : > { %v976_v8 = vpop.permute.xlu0 %975 }
 0x358   : > { %v2714_v2 = vpop.eup %2713 }
 0x359   : > { %v822_v3 = vmul.f32 %v2714_v2, %v820_v61  ;;  %v1106_v61 = vpop.permute.xlu1 %1105 }
 0x35a   : > { %v972_v10 = vpop.permute.xlu0 %971 }
 0x35b   : > { %v823_v4 = vsub.f32 2.0, %v822_v3 }
 0x35d   : > { %v824_v5 = vmul.f32 %v2714_v2, %v823_v4  ;;  %v1102_v1 = vpop.permute.xlu1 %1101 }
 0x35e   : > { %v968_v24 = vpop.permute.xlu0 %967 }
 0x35f   : > { %v3497_v6 = vmul.f32 %v2712_v57, %v824_v5 }
 0x361   : > { %2387 = vmatmul.mubr.f32.vlgmr.msra.gmra.mxu1 %v3497_v6 }
 0x362   : > { %2390 = vmatpush3.xpose.msk.msra.mxu1 %vm691_vm3, %v978_v7  ;;  %2421 = vmatprep.mubr.msk.f32.mxu1 %vm2987_vm1, %v2986_v0  ;;  %v964_v28 = vpop.permute.xlu0 %963 }
 0x363   : > { %2391 = vmatprep.subr.mxu1 %v2986_v0 }
 0x366   : > { %2392 = vmatpush3.xpose.msk.msra.mxu1 %vm691_vm3, %v976_v8  ;;  %v960_v30 = vpop.permute.xlu0 %959 }
 0x367   : > { %2393 = vmatprep.subr.mxu1 %v2986_v0 }
 0x36a   : > { %2394 = vmatpush3.xpose.msk.msra.mxu1 %vm691_vm3, %v974_v9  ;;  %v956_v32 = vpop.permute.xlu0 %955 }
 0x36b   : > { %2395 = vmatprep.subr.mxu1 %v2986_v0 }
 0x36e   : > { %2396 = vmatpush3.xpose.msk.msra.mxu1 %vm691_vm3, %v972_v10  ;;  %v952_v34 = vpop.permute.xlu0 %951 }
 0x36f   : > { %2397 = vmatprep.subr.mxu1 %v2986_v0 }
 0x372   : > { %2398 = vmatpush3.xpose.msk.msra.mxu1 %vm691_vm3, %v970_v11  ;;  %v948_v36 = vpop.permute.xlu0 %947 }
 0x373   : > { %2399 = vmatprep.subr.mxu1 %v2986_v0 }
 0x376   : > { %2400 = vmatpush3.xpose.msk.msra.mxu1 %vm691_vm3, %v968_v24 }
 0x377   : > { %2401 = vmatprep.subr.mxu1 %v2986_v0 }
 0x37a   : > { %2402 = vmatpush3.xpose.msk.msra.mxu1 %vm691_vm3, %v966_v27 }
 0x37b   : > { %2403 = vmatprep.subr.mxu1 %v2986_v0 }
 0x37e   : > { %2404 = vmatpush3.xpose.msk.msra.mxu1 %vm691_vm3, %v964_v28 }
 0x37f   : > { %2405 = vmatprep.subr.mxu1 %v2986_v0 }
 0x382   : > { %2406 = vmatpush3.xpose.msk.msra.mxu1 %vm691_vm3, %v962_v29 }
 0x383   : > { %2407 = vmatprep.subr.mxu1 %v2986_v0 }
 0x386   : > { %2408 = vmatpush3.xpose.msk.msra.mxu1 %vm691_vm3, %v960_v30 }
 0x387   : > { %2409 = vmatprep.subr.mxu1 %v2986_v0 }
 0x38a   : > { %2410 = vmatpush3.xpose.msk.msra.mxu1 %vm691_vm3, %v958_v31 }
 0x38b   : > { %2411 = vmatprep.subr.mxu1 %v2986_v0 }
 0x38e   : > { %2412 = vmatpush3.xpose.msk.msra.mxu1 %vm691_vm3, %v956_v32 }
 0x38f   : > { %2413 = vmatprep.subr.mxu1 %v2986_v0 }
 0x392   : > { %2414 = vmatpush3.xpose.msk.msra.mxu1 %vm691_vm3, %v954_v33 }
 0x393   : > { %2415 = vmatprep.subr.mxu1 %v2986_v0 }
 0x396   : > { %2416 = vmatpush3.xpose.msk.msra.mxu1 %vm691_vm3, %v952_v34 }
 0x397   : > { %2417 = vmatprep.subr.mxu1 %v2986_v0 }
 0x39a   : > { %2418 = vmatpush3.xpose.msk.msra.mxu1 %vm691_vm3, %v950_v35 }
 0x39b   : > { %2419 = vmatprep.subr.mxu1 %v2986_v0 }
 0x39e   : > { %2420 = vmatpush3.xpose.msk.msra.mxu1 %vm691_vm3, %v948_v36 }
 0x39f   : > { %2494 = vmatprep.subr.mxu1 %v2986_v0 }
 0x3a1   : > { %2422 = vmatmul.mubr.msk.f32.vlgmr.msra.gmra.mxu1 %vm691_vm3, %v946_v38 }
 0x3a2   : > { %2526 = vmatprep.mubr.msk.f32.mxu1 %vm2987_vm1, %v2986_v0 }
 0x421   : > { %v3551_v41 = vpop.f32.mrf.mxu1 }
 0x423   : > { %v2388_v43 = vpop.f32.mrf.mxu1 }
 0x461   : > { %v1079_v44 = vpop.f32.mrf.mxu1 }
 0x462   : > { %v1083_v45 = vsel %vm689_vm5, %v1079_v44, -1e+30 }
 0x463   : > { %1084 = vmax.xlane.f32.xlu0 %v1083_v45  ;;  %v2423_v46 = vpop.f32.mrf.mxu1 }
 0x479   : > { %1127 = vrot.lane.b32.xlu0 %v3305_v12, %s2990_s24 }
 0x47d   : > { %1123 = vrot.lane.b32.xlu0 %v3327_v14, %s2990_s24 }
 0x481   : > { %1119 = vrot.lane.b32.xlu0 %v3336_v16, %s2990_s24 }
 0x485   : > { %1115 = vrot.lane.b32.xlu0 %v3350_v18, %s2990_s24 }
 0x489   : > { %1111 = vrot.lane.b32.xlu0 %v3364_v20, %s2990_s24 }
 0x48d   : > { %1107 = vrot.lane.b32.xlu0 %v3371_v21, %s2990_s24 }
 0x491   : > { %1103 = vrot.lane.b32.xlu0 %v3394_v25, %s2990_s24 }
 0x495   : > { %1099 = vrot.lane.b32.xlu0 %v3416_v37, %s2990_s24 }
 0x499   : > { %1247 = vrot.lane.b32.xlu0 %v3305_v12, %s2991_s11 }
 0x49d   : > { %1243 = vrot.lane.b32.xlu0 %v3327_v14, %s2991_s11 }
 0x4a1   : > { %1239 = vrot.lane.b32.xlu0 %v3336_v16, %s2991_s11 }
 0x4a5   : > { %1235 = vrot.lane.b32.xlu0 %v3350_v18, %s2991_s11 }
 0x4a9   : > { %1231 = vrot.lane.b32.xlu0 %v3364_v20, %s2991_s11 }
 0x4ad   : > { %1227 = vrot.lane.b32.xlu0 %v3371_v21, %s2991_s11 }
 0x4b1   : > { %1223 = vrot.lane.b32.xlu0 %v3394_v25, %s2991_s11 }
 0x4b5   : > { %1219 = vrot.lane.b32.xlu0 %v3416_v37, %s2991_s11 }
 0x4b9   : > { %1215 = vrot.lane.b32.xlu0 %v3423_v39, %s2991_s11 }
 0x4bd   : > { %1397 = vrot.lane.b32.xlu0 %v3305_v12, %s2992_s21 }
 0x4c1   : > { %1391 = vrot.lane.b32.xlu0 %v3329_v15, %s2992_s21 }
 0x4c5   : > { %1387 = vrot.lane.b32.xlu0 %v3343_v17, %s2992_s21 }
 0x4c9   : > { %1383 = vrot.lane.b32.xlu0 %v3357_v19, %s2992_s21 }
 0x4cd   : > { %1379 = vrot.lane.b32.xlu0 %v3378_v22, %s2992_s21 }
 0x4d1   : > { %1375 = vrot.lane.b32.xlu0 %v3386_v23, %s2992_s21 }
 0x4ec   : > { %v1085_v49 = vpop.xlane.xlu0 %1084 }
 0x4ed   : > { %v1086_v50 = vsub.f32 %v1083_v45, %v1085_v49 }
 0x4ef   : > { %v1087_v51 = vmul.f32 1.442695, %v1086_v50 }
 0x4f0   : > { %v1128_v52 = vpop.permute.xlu0 %1127 }
 0x4f1   : > { %2715 = vpow2.f32 %v1087_v51  ;;  %2425 = vmatpush3.msra.mxu0 %v1128_v52 }
 0x4f2   : > { %2426 = vmatprep.subr.mxu0 %v2986_v0 }
 0x4f3   : > { %2427 = vmatpush3.msra.mxu0 %v1126_v47 }
 0x4f4   : > { %2428 = vmatprep.subr.mxu0 %v2986_v0  ;;  %v1124_v54 = vpop.permute.xlu0 %1123 }
 0x4f5   : > { %2429 = vmatpush3.msra.mxu0 %v1124_v54 }
 0x4f6   : > { %2430 = vmatprep.subr.mxu0 %v2986_v0 }
 0x4f7   : > { %2431 = vmatpush3.msra.mxu0 %v1122_v48 }
 0x4f8   : > { %2432 = vmatprep.subr.mxu0 %v2986_v0  ;;  %v1120_v56 = vpop.permute.xlu0 %1119 }
 0x4f9   : > { %2433 = vmatpush3.msra.mxu0 %v1120_v56 }
 0x4fa   : > { %2434 = vmatprep.subr.mxu0 %v2986_v0 }
 0x4fb   : > { %2435 = vmatpush3.msra.mxu0 %v1118_v53 }
 0x4fc   : > { %2436 = vmatprep.subr.mxu0 %v2986_v0  ;;  %v1116_v57 = vpop.permute.xlu0 %1115 }
 0x4fd   : > { %2437 = vmatpush3.msra.mxu0 %v1116_v57 }
 0x4fe   : > { %v2716_v59 = vpop.eup %2715  ;;  %2438 = vmatprep.subr.mxu0 %v2986_v0 }
 0x4ff   : > { %1089 = vadd.xlane.f32.xlu1 %v2716_v59  ;;  %2439 = vmatpush3.msra.mxu0 %v1114_v55 }
 0x500   : > { %2440 = vmatprep.subr.mxu0 %v2986_v0  ;;  %v1112_v60 = vpop.permute.xlu0 %1111 }
 0x501   : > { %2441 = vmatpush3.msra.mxu0 %v1112_v60 }
 0x502   : > { %2442 = vmatprep.subr.mxu0 %v2986_v0 }
 0x503   : > { %2443 = vmatpush3.msra.mxu0 %v1110_v58 }
 0x504   : > { %2444 = vmatprep.subr.mxu0 %v2986_v0  ;;  %v1108_v62 = vpop.permute.xlu0 %1107 }
 0x505   : > { %2445 = vmatpush3.msra.mxu0 %v1108_v62 }
 0x506   : > { %2446 = vmatprep.subr.mxu0 %v2986_v0 }
 0x507   : > { %2447 = vmatpush3.msra.mxu0 %v1106_v61 }
 0x508   : > { %2448 = vmatprep.subr.mxu0 %v2986_v0  ;;  %v1104_v63 = vpop.permute.xlu0 %1103 }
 0x509   : > { %2449 = vmatpush3.msra.mxu0 %v1104_v63 }
 0x50a   : > { %2450 = vmatprep.subr.mxu0 %v2986_v0 }
 0x50b   : > { %2451 = vmatpush3.msra.mxu0 %v1102_v1 }
 0x50c   : > { %2452 = vmatprep.subr.mxu0 %v2986_v0  ;;  %v1100_v2 = vpop.permute.xlu0 %1099 }
 0x50d   : > { %2453 = vmatpush3.msra.mxu0 %v1100_v2 }
 0x50e   : > { %2454 = vmatprep.subr.mxu0 %v2986_v0 }
 0x510   : > { %1097 = vrot.lane.b32.xlu1 %v3425_v40, %s2990_s24  ;;  %v1248_v11 = vpop.permute.xlu0 %1247  ;;  %s1865_s24 = scalar_lea.sflag [#allocation14], %s3235_s4 }
 0x514   : > { %1245 = vrot.lane.b32.xlu1 %v3315_v13, %s2991_s11  ;;  %v1244_v27 = vpop.permute.xlu0 %1243 }
 0x518   : > { %1241 = vrot.lane.b32.xlu1 %v3329_v15, %s2991_s11  ;;  %v1240_v29 = vpop.permute.xlu0 %1239 }
 0x51c   : > { %1237 = vrot.lane.b32.xlu1 %v3343_v17, %s2991_s11  ;;  %v1236_v31 = vpop.permute.xlu0 %1235 }
 0x520   : > { %1233 = vrot.lane.b32.xlu1 %v3357_v19, %s2991_s11  ;;  %v1232_v33 = vpop.permute.xlu0 %1231 }
 0x524   : > { %1229 = vrot.lane.b32.xlu1 %v3378_v22, %s2991_s11  ;;  %v1228_v35 = vpop.permute.xlu0 %1227 }
 0x528   : > { %1225 = vrot.lane.b32.xlu1 %v3386_v23, %s2991_s11  ;;  %v1224_v38 = vpop.permute.xlu0 %1223 }
 0x52c   : > { %1221 = vrot.lane.b32.xlu1 %v3401_v26, %s2991_s11  ;;  %v1220_v44 = vpop.permute.xlu0 %1219 }
 0x530   : > { %1217 = vrot.lane.b32.xlu1 %v3425_v40, %s2991_s11  ;;  %v1216_v46 = vpop.permute.xlu0 %1215  ;;  %s2871_s11 = scalar_lea.vmem %s1892_s2, 128 }
 0x531   : > { %p2872_p12 = scmp.ne.s32.totalorder %s1892_s2, %s2871_s11 }
 0x533   : > { %p2873_p13 = pnand %p2872_p12, %p3947_p9 }
 0x535   : > { %p2874_p0 = pneg %p2873_p13 }
 0x588   : > { %v1090_v3 = vpop.xlane.xlu1 %1089 }
 0x589   : > { %2717 = vrcp.f32 %v1090_v3 }
 0x58c   : > { %v1098_v4 = vpop.permute.xlu1 %1097 }
 0x58d   : > { %2455 = vmatpush3.msra.mxu0 %v1098_v4 }
 0x58e   : > { %2459 = vmatprep.subr.mxu0 %v2986_v0 }
 0x590   : > { %v1246_v24 = vpop.permute.xlu1 %1245 }
 0x594   : > { %v1242_v28 = vpop.permute.xlu1 %1241 }
 0x596   : > { %v2718_v5 = vpop.eup %2717 }
 0x597   : > { %v1092_v7 = vmul.f32 %v2718_v5, %v1090_v3 }
 0x598   : > { %v1238_v30 = vpop.permute.xlu1 %1237 }
 0x599   : > { %v1093_v8 = vsub.f32 2.0, %v1092_v7 }
 0x59b   : > { %v1094_v9 = vmul.f32 %v2718_v5, %v1093_v8 }
 0x59c   : > { %v1234_v32 = vpop.permute.xlu1 %1233 }
 0x59d   : > { %v3623_v10 = vmul.f32 %v2716_v59, %v1094_v9 }
 0x59f   : > { %2457 = vmatmul.mubr.f32.vlgmr.msra.gmra.mxu0 %v3623_v10 }
 0x5a0   : > { %2460 = vmatpush3.xpose.msk.msra.mxu0 %vm691_vm3, %v1248_v11  ;;  %2491 = vmatprep.mubr.msk.f32.mxu0 %vm2987_vm1, %v2986_v0  ;;  %v1230_v34 = vpop.permute.xlu1 %1229 }
 0x5a1   : > { %2461 = vmatprep.subr.mxu0 %v2986_v0 }
 0x5a4   : > { %2462 = vmatpush3.xpose.msk.msra.mxu0 %vm691_vm3, %v1246_v24  ;;  %v1226_v36 = vpop.permute.xlu1 %1225 }
 0x5a5   : > { %2463 = vmatprep.subr.mxu0 %v2986_v0 }
 0x5a8   : > { %2464 = vmatpush3.xpose.msk.msra.mxu0 %vm691_vm3, %v1244_v27  ;;  %v1222_v43 = vpop.permute.xlu1 %1221 }
 0x5a9   : > { %2465 = vmatprep.subr.mxu0 %v2986_v0 }
 0x5ac   : > { %2466 = vmatpush3.xpose.msk.msra.mxu0 %vm691_vm3, %v1242_v28  ;;  %v1218_v45 = vpop.permute.xlu1 %1217 }
 0x5ad   : > { %2467 = vmatprep.subr.mxu0 %v2986_v0 }
 0x5b0   : > { %2468 = vmatpush3.xpose.msk.msra.mxu0 %vm691_vm3, %v1240_v29 }
 0x5b1   : > { %2469 = vmatprep.subr.mxu0 %v2986_v0 }
 0x5b4   : > { %2470 = vmatpush3.xpose.msk.msra.mxu0 %vm691_vm3, %v1238_v30 }
 0x5b5   : > { %2471 = vmatprep.subr.mxu0 %v2986_v0 }
 0x5b8   : > { %2472 = vmatpush3.xpose.msk.msra.mxu0 %vm691_vm3, %v1236_v31 }
 0x5b9   : > { %2473 = vmatprep.subr.mxu0 %v2986_v0 }
 0x5bc   : > { %2474 = vmatpush3.xpose.msk.msra.mxu0 %vm691_vm3, %v1234_v32 }
 0x5bd   : > { %2475 = vmatprep.subr.mxu0 %v2986_v0 }
 0x5c0   : > { %2476 = vmatpush3.xpose.msk.msra.mxu0 %vm691_vm3, %v1232_v33 }
 0x5c1   : > { %2477 = vmatprep.subr.mxu0 %v2986_v0 }
 0x5c4   : > { %2478 = vmatpush3.xpose.msk.msra.mxu0 %vm691_vm3, %v1230_v34 }
 0x5c5   : > { %2479 = vmatprep.subr.mxu0 %v2986_v0 }
 0x5c8   : > { %2480 = vmatpush3.xpose.msk.msra.mxu0 %vm691_vm3, %v1228_v35 }
 0x5c9   : > { %2481 = vmatprep.subr.mxu0 %v2986_v0 }
 0x5cc   : > { %2482 = vmatpush3.xpose.msk.msra.mxu0 %vm691_vm3, %v1226_v36 }
 0x5cd   : > { %2483 = vmatprep.subr.mxu0 %v2986_v0 }
 0x5d0   : > { %2484 = vmatpush3.xpose.msk.msra.mxu0 %vm691_vm3, %v1224_v38  ;;  %v2727_v38 = vld [vmem:[#allocation2 + $0x70] sm:$0xff] }
 0x5d1   : > { %2485 = vmatprep.subr.mxu0 %v2986_v0 }
 0x5d4   : > { %2486 = vmatpush3.xpose.msk.msra.mxu0 %vm691_vm3, %v1222_v43  ;;  %v2728_v43 = vld [vmem:[#allocation2 + $0x60] sm:$0xff] }
 0x5d5   : > { %2487 = vmatprep.subr.mxu0 %v2986_v0 }
 0x5d8   : > { %2488 = vmatpush3.xpose.msk.msra.mxu0 %vm691_vm3, %v1220_v44  ;;  %v2729_v44 = vld [vmem:[#allocation2 + $0x50] sm:$0xff] }
 0x5d9   : > { %2489 = vmatprep.subr.mxu0 %v2986_v0 }
 0x5dc   : > { %2490 = vmatpush3.xpose.msk.msra.mxu0 %vm691_vm3, %v1218_v45 }
 0x5dd   : > { %2564 = vmatprep.subr.mxu0 %v2986_v0 }
 0x5df   : > { %2492 = vmatmul.mubr.msk.f32.vlgmr.msra.gmra.mxu0 %vm691_vm3, %v1216_v46 }
 0x5e0   : > { %2596 = vmatprep.mubr.msk.f32.mxu0 %vm2987_vm1, %v2986_v0 }
 0x65f   : > { %v3675_v47 = vpop.f32.mrf.mxu0 }
 0x661   : > { %v2458_v48 = vpop.f32.mrf.mxu0 }
 0x69f   : > { %v1349_v49 = vpop.f32.mrf.mxu0 }
 0x6a0   : > { %v1353_v50 = vsel %vm689_vm5, %v1349_v49, -1e+30 }
 0x6a1   : > { %1354 = vmax.xlane.f32.xlu1 %v1353_v50  ;;  %v2493_v51 = vpop.f32.mrf.mxu0 }
 0x6a2   : > { %v2730_v51 = vld [vmem:[#allocation2 + $0x78] sm:$0xff] }
 0x6b2   : > { %1395 = vrot.lane.b32.xlu1 %v3315_v13, %s2992_s21 }
 0x6b6   : > { %1393 = vrot.lane.b32.xlu1 %v3327_v14, %s2992_s21 }
 0x6ba   : > { %1389 = vrot.lane.b32.xlu1 %v3336_v16, %s2992_s21 }
 0x6be   : > { %1385 = vrot.lane.b32.xlu1 %v3350_v18, %s2992_s21 }
 0x6c2   : > { %1381 = vrot.lane.b32.xlu1 %v3364_v20, %s2992_s21 }
 0x6c6   : > { %1377 = vrot.lane.b32.xlu1 %v3371_v21, %s2992_s21 }
 0x6ca   : > { %1373 = vrot.lane.b32.xlu1 %v3394_v25, %s2992_s21 }
 0x6ce   : > { %1369 = vrot.lane.b32.xlu1 %v3416_v37, %s2992_s21 }
 0x6d2   : > { %1517 = vrot.lane.b32.xlu1 %v3305_v12, %s2993_s23  ;;  %v1398_v12 = vpop.permute.xlu0 %1397 }
 0x6d3   : > { %2495 = vmatpush3.msra.mxu1 %v1398_v12  ;;  %v2735_v12 = vld [vmem:[#allocation2 + $0x28] sm:$0xff] }
 0x6d4   : > { %2496 = vmatprep.subr.mxu1 %v2986_v0 }
 0x6d6   : > { %1513 = vrot.lane.b32.xlu1 %v3327_v14, %s2993_s23 }
 0x6da   : > { %1509 = vrot.lane.b32.xlu1 %v3336_v16, %s2993_s23  ;;  %v1392_v16 = vpop.permute.xlu0 %1391 }
 0x6de   : > { %1505 = vrot.lane.b32.xlu1 %v3350_v18, %s2993_s23 }
 0x6e2   : > { %1501 = vrot.lane.b32.xlu1 %v3364_v20, %s2993_s23 }
 0x6e6   : > { %1497 = vrot.lane.b32.xlu1 %v3371_v21, %s2993_s23  ;;  %v1388_v21 = vpop.permute.xlu0 %1387 }
 0x6ea   : > { %1493 = vrot.lane.b32.xlu1 %v3394_v25, %s2993_s23  ;;  %v1384_v54 = vpop.permute.xlu0 %1383 }
 0x6ee   : > { %1489 = vrot.lane.b32.xlu1 %v3416_v37, %s2993_s23  ;;  %v1380_v57 = vpop.permute.xlu0 %1379 }
 0x6f2   : > { %1485 = vrot.lane.b32.xlu1 %v3423_v39, %s2993_s23  ;;  %v1376_v60 = vpop.permute.xlu0 %1375 }
 0x6f6   : > { %1665 = vrot.lane.b32.xlu1 %v2727_v38, %s2994_s15 }
 0x6fa   : > { %1661 = vrot.lane.b32.xlu1 %v2728_v43, %s2994_s15 }
 0x6fe   : > { %1657 = vrot.lane.b32.xlu1 %v2729_v44, %s2994_s15 }
 0x702   : > { %1653 = vrot.lane.b32.xlu1 %v3357_v19, %s2994_s15 }
 0x706   : > { %1649 = vrot.lane.b32.xlu1 %v3378_v22, %s2994_s15 }
 0x70a   : > { %1645 = vrot.lane.b32.xlu1 %v3386_v23, %s2994_s15 }
 0x70e   : > { %1641 = vrot.lane.b32.xlu1 %v3401_v26, %s2994_s15 }
 0x72a   : > { %v1355_v14 = vpop.xlane.xlu1 %1354 }
 0x72b   : > { %v1356_v18 = vsub.f32 %v1353_v50, %v1355_v14 }
 0x72d   : > { %v1357_v20 = vmul.f32 1.442695, %v1356_v18 }
 0x72e   : > { %v1396_v52 = vpop.permute.xlu1 %1395 }
 0x72f   : > { %2719 = vpow2.f32 %v1357_v20  ;;  %2497 = vmatpush3.msra.mxu1 %v1396_v52 }
 0x730   : > { %2498 = vmatprep.subr.mxu1 %v2986_v0 }
 0x732   : > { %v1394_v53 = vpop.permute.xlu1 %1393 }
 0x733   : > { %2499 = vmatpush3.msra.mxu1 %v1394_v53 }
 0x734   : > { %2500 = vmatprep.subr.mxu1 %v2986_v0 }
 0x735   : > { %2501 = vmatpush3.msra.mxu1 %v1392_v16 }
 0x736   : > { %v1390_v39 = vpop.permute.xlu1 %1389  ;;  %2502 = vmatprep.subr.mxu1 %v2986_v0 }
 0x737   : > { %2503 = vmatpush3.msra.mxu1 %v1390_v39 }
 0x738   : > { %2504 = vmatprep.subr.mxu1 %v2986_v0 }
 0x739   : > { %2505 = vmatpush3.msra.mxu1 %v1388_v21 }
 0x73a   : > { %v1386_v55 = vpop.permute.xlu1 %1385  ;;  %2506 = vmatprep.subr.mxu1 %v2986_v0 }
 0x73b   : > { %2507 = vmatpush3.msra.mxu1 %v1386_v55 }
 0x73c   : > { %v2720_v56 = vpop.eup %2719  ;;  %2508 = vmatprep.subr.mxu1 %v2986_v0 }
 0x73d   : > { %1359 = vadd.xlane.f32.xlu0 %v2720_v56  ;;  %2509 = vmatpush3.msra.mxu1 %v1384_v54 }
 0x73e   : > { %v1382_v58 = vpop.permute.xlu1 %1381  ;;  %2510 = vmatprep.subr.mxu1 %v2986_v0 }
 0x73f   : > { %2511 = vmatpush3.msra.mxu1 %v1382_v58 }
 0x740   : > { %2512 = vmatprep.subr.mxu1 %v2986_v0 }
 0x741   : > { %2513 = vmatpush3.msra.mxu1 %v1380_v57 }
 0x742   : > { %v1378_v59 = vpop.permute.xlu1 %1377  ;;  %2514 = vmatprep.subr.mxu1 %v2986_v0 }
 0x743   : > { %2515 = vmatpush3.msra.mxu1 %v1378_v59 }
 0x744   : > { %2516 = vmatprep.subr.mxu1 %v2986_v0 }
 0x745   : > { %2517 = vmatpush3.msra.mxu1 %v1376_v60 }
 0x746   : > { %v1374_v61 = vpop.permute.xlu1 %1373  ;;  %2518 = vmatprep.subr.mxu1 %v2986_v0 }
 0x747   : > { %2519 = vmatpush3.msra.mxu1 %v1374_v61  ;;  %v2736_v61 = vld [vmem:[#allocation2] sm:$0xff] }
 0x748   : > { %2520 = vmatprep.subr.mxu1 %v2986_v0 }
 0x753   : > { %1371 = vrot.lane.b32.xlu0 %v3401_v26, %s2992_s21 }
 0x757   : > { %1367 = vrot.lane.b32.xlu0 %v3425_v40, %s2992_s21  ;;  %s2998_s21 = smov [#allocation13]  }
 0x75b   : > { %1515 = vrot.lane.b32.xlu0 %v3315_v13, %s2993_s23 }
 0x75f   : > { %1511 = vrot.lane.b32.xlu0 %v3329_v15, %s2993_s23 }
 0x763   : > { %1507 = vrot.lane.b32.xlu0 %v3343_v17, %s2993_s23  ;;  %v1370_v17 = vpop.permute.xlu1 %1369 }
 0x767   : > { %1503 = vrot.lane.b32.xlu0 %v3357_v19, %s2993_s23  ;;  %v1518_v5 = vpop.permute.xlu1 %1517  ;;  %v2731_v19 = vld [vmem:[#allocation2 + $0x68] sm:$0xff] }
 0x76b   : > { %1499 = vrot.lane.b32.xlu0 %v3378_v22, %s2993_s23  ;;  %v1514_v9 = vpop.permute.xlu1 %1513  ;;  %v2732_v22 = vld [vmem:[#allocation2 + $0x58] sm:$0xff] }
 0x76f   : > { %1495 = vrot.lane.b32.xlu0 %v3386_v23, %s2993_s23  ;;  %v2733_v23 = vld [vmem:[#allocation2 + $0x48] sm:$0xff] }
 0x773   : > { %1491 = vrot.lane.b32.xlu0 %v3401_v26, %s2993_s23  ;;  %v2734_v26 = vld [vmem:[#allocation2 + $0x38] sm:$0xff] }
 0x777   : > { %1487 = vrot.lane.b32.xlu0 %v3425_v40, %s2993_s23  ;;  %v1096_v40 = vadd.f32 %v3623_v10, %v3497_v6  ;;  %v1510_v10 = vpop.permute.xlu1 %1509  ;;  %s2875_s23 = sshll.u32 %s2998_s21, 4  ;;  %s2876_s23 = int_to_ptr.vmem [resolvable:$false] %s2875_s23 }
 0x778   : > { %p2878_p11 = scmp.lt.s32.totalorder %s1892_s2, %s2876_s23 }
 0x77b   : > { %v1506_v24 = vpop.permute.xlu1 %1505 }
 0x77f   : > { %v1502_v28 = vpop.permute.xlu1 %1501 }
 0x783   : > { %v1498_v30 = vpop.permute.xlu1 %1497 }
 0x787   : > { %v1494_v32 = vpop.permute.xlu1 %1493 }
 0x78b   : > { %v1490_v34 = vpop.permute.xlu1 %1489 }
 0x78f   : > { %v1486_v36 = vpop.permute.xlu1 %1485 }
 0x793   : > { %v1666_v42 = vpop.permute.xlu1 %1665 }
 0x797   : > { %v1662_v14 = vpop.permute.xlu1 %1661 }
 0x79b   : > { %v1658_v21 = vpop.permute.xlu1 %1657 }
 0x7c6   : > { %v1360_v13 = vpop.xlane.xlu0 %1359 }
 0x7c7   : > { %2721 = vrcp.f32 %v1360_v13 }
 0x7ca   : > { %v1372_v15 = vpop.permute.xlu0 %1371 }
 0x7cb   : > { %2521 = vmatpush3.msra.mxu1 %v1372_v15 }
 0x7cc   : > { %2522 = vmatprep.subr.mxu1 %v2986_v0 }
 0x7cd   : > { %2523 = vmatpush3.msra.mxu1 %v1370_v17 }
 0x7ce   : > { %v1368_v62 = vpop.permute.xlu0 %1367  ;;  %2524 = vmatprep.subr.mxu1 %v2986_v0 }
 0x7cf   : > { %2525 = vmatpush3.msra.mxu1 %v1368_v62 }
 0x7d0   : > { %2529 = vmatprep.subr.mxu1 %v2986_v0 }
 0x7d2   : > { %v1516_v8 = vpop.permute.xlu0 %1515 }
 0x7d4   : > { %v2722_v63 = vpop.eup %2721 }
 0x7d5   : > { %v1362_v1 = vmul.f32 %v2722_v63, %v1360_v13 }
 0x7d6   : > { %v1512_v6 = vpop.permute.xlu0 %1511 }
 0x7d7   : > { %v1363_v2 = vsub.f32 2.0, %v1362_v1 }
 0x7d9   : > { %v1364_v3 = vmul.f32 %v2722_v63, %v1363_v2 }
 0x7da   : > { %v1508_v11 = vpop.permute.xlu0 %1507 }
 0x7db   : > { %v1365_v4 = vmul.f32 %v2720_v56, %v1364_v3 }
 0x7dd   : > { %v3751_v7 = vadd.f32 %v1365_v4, %v1096_v40  ;;  %2527 = vmatmul.mubr.f32.vlgmr.msra.gmra.mxu1 %v1365_v4  ;;  %v1775_v4 = vld [vmem:[#allocation11 + $0x18] sm:$0xff] }
 0x7de   : > { %2530 = vmatpush3.xpose.msk.msra.mxu1 %vm691_vm3, %v1518_v5  ;;  %2561 = vmatprep.mubr.msk.f32.mxu1 %vm2987_vm1, %v2986_v0  ;;  %v1504_v27 = vpop.permute.xlu0 %1503  ;;  %v1774_v5 = vld [vmem:[#allocation11 + $0x10] sm:$0xff] }
 0x7df   : > { %2531 = vmatprep.subr.mxu1 %v2986_v0 }
 0x7e2   : > { %2532 = vmatpush3.xpose.msk.msra.mxu1 %vm691_vm3, %v1516_v8  ;;  %v1500_v29 = vpop.permute.xlu0 %1499  ;;  %v1773_v8 = vld [vmem:[#allocation11 + $0x8] sm:$0xff] }
 0x7e3   : > { %2533 = vmatprep.subr.mxu1 %v2986_v0 }
 0x7e6   : > { %2534 = vmatpush3.xpose.msk.msra.mxu1 %vm691_vm3, %v1514_v9  ;;  %v1496_v31 = vpop.permute.xlu0 %1495 }
 0x7e7   : > { %2535 = vmatprep.subr.mxu1 %v2986_v0 }
 0x7ea   : > { %2536 = vmatpush3.xpose.msk.msra.mxu1 %vm691_vm3, %v1512_v6  ;;  %v1492_v33 = vpop.permute.xlu0 %1491 }
 0x7eb   : > { %2537 = vmatprep.subr.mxu1 %v2986_v0 }
 0x7ee   : > { %2538 = vmatpush3.xpose.msk.msra.mxu1 %vm691_vm3, %v1510_v10  ;;  %v1488_v35 = vpop.permute.xlu0 %1487 }
 0x7ef   : > { %2539 = vmatprep.subr.mxu1 %v2986_v0 }
 0x7f2   : > { %2540 = vmatpush3.xpose.msk.msra.mxu1 %vm691_vm3, %v1508_v11 }
 0x7f3   : > { %2541 = vmatprep.subr.mxu1 %v2986_v0 }
 0x7f6   : > { %2542 = vmatpush3.xpose.msk.msra.mxu1 %vm691_vm3, %v1506_v24 }
 0x7f7   : > { %2543 = vmatprep.subr.mxu1 %v2986_v0 }
 0x7fa   : > { %2544 = vmatpush3.xpose.msk.msra.mxu1 %vm691_vm3, %v1504_v27 }
 0x7fb   : > { %2545 = vmatprep.subr.mxu1 %v2986_v0 }
 0x7fe   : > { %2546 = vmatpush3.xpose.msk.msra.mxu1 %vm691_vm3, %v1502_v28 }
 0x7ff   : > { %2547 = vmatprep.subr.mxu1 %v2986_v0 }
 0x802   : > { %2548 = vmatpush3.xpose.msk.msra.mxu1 %vm691_vm3, %v1500_v29 }
 0x803   : > { %2549 = vmatprep.subr.mxu1 %v2986_v0 }
 0x806   : > { %2550 = vmatpush3.xpose.msk.msra.mxu1 %vm691_vm3, %v1498_v30 }
 0x807   : > { %2551 = vmatprep.subr.mxu1 %v2986_v0 }
 0x80a   : > { %2552 = vmatpush3.xpose.msk.msra.mxu1 %vm691_vm3, %v1496_v31 }
 0x80b   : > { %2553 = vmatprep.subr.mxu1 %v2986_v0 }
 0x80e   : > { %2554 = vmatpush3.xpose.msk.msra.mxu1 %vm691_vm3, %v1494_v32 }
 0x80f   : > { %2555 = vmatprep.subr.mxu1 %v2986_v0 }
 0x812   : > { %2556 = vmatpush3.xpose.msk.msra.mxu1 %vm691_vm3, %v1492_v33 }
 0x813   : > { %2557 = vmatprep.subr.mxu1 %v2986_v0 }
 0x816   : > { %2558 = vmatpush3.xpose.msk.msra.mxu1 %vm691_vm3, %v1490_v34 }
 0x817   : > { %2559 = vmatprep.subr.mxu1 %v2986_v0 }
 0x81a   : > { %2560 = vmatpush3.xpose.msk.msra.mxu1 %vm691_vm3, %v1488_v35 }
 0x81d   : > { %2562 = vmatmul.mubr.msk.f32.vlgmr.msra.gmra.mxu1 %vm691_vm3, %v1486_v36 }
 0x89d   : > { %v3798_v45 = vpop.f32.mrf.mxu1 }
 0x89f   : > { %v2528_v46 = vpop.f32.mrf.mxu1 }
 0x8dd   : > { %v1619_v48 = vpop.f32.mrf.mxu1 }
 0x8de   : > { %v1623_v49 = vsel %vm689_vm5, %v1619_v48, -1e+30 }
 0x8df   : > { %1624 = vmax.xlane.f32.xlu0 %v1623_v49  ;;  %v2563_v50 = vpop.f32.mrf.mxu1 }
 0x8f5   : > { %1667 = vrot.lane.b32.xlu0 %v2730_v51, %s2994_s15 }
 0x8f9   : > { %1663 = vrot.lane.b32.xlu0 %v2731_v19, %s2994_s15 }
 0x8fd   : > { %1659 = vrot.lane.b32.xlu0 %v2732_v22, %s2994_s15 }
 0x901   : > { %1655 = vrot.lane.b32.xlu0 %v2733_v23, %s2994_s15 }
 0x905   : > { %1651 = vrot.lane.b32.xlu0 %v2734_v26, %s2994_s15 }
 0x909   : > { %1647 = vrot.lane.b32.xlu0 %v2735_v12, %s2994_s15 }
 0x90d   : > { %1643 = vrot.lane.b32.xlu0 %v3394_v25, %s2994_s15  ;;  %v1654_v25 = vpop.permute.xlu1 %1653 }
 0x911   : > { %1639 = vrot.lane.b32.xlu0 %v3416_v37, %s2994_s15  ;;  %v1650_v39 = vpop.permute.xlu1 %1649 }
 0x915   : > { %1756 = vrot.lane.b32.xlu0 %v3675_v47, %s2995_s27  ;;  %v1646_v56 = vpop.permute.xlu1 %1645 }
 0x919   : > { %v1642_v59 = vpop.permute.xlu1 %1641 }
 0x968   : > { %v1625_v16 = vpop.xlane.xlu0 %1624 }
 0x969   : > { %v1626_v18 = vsub.f32 %v1623_v49, %v1625_v16 }
 0x96b   : > { %v1627_v20 = vmul.f32 1.442695, %v1626_v18 }
 0x96c   : > { %v1668_v52 = vpop.permute.xlu0 %1667 }
 0x96d   : > { %2723 = vpow2.f32 %v1627_v20  ;;  %2565 = vmatpush3.msra.mxu0 %v1668_v52 }
 0x96e   : > { %2566 = vmatprep.subr.mxu0 %v2986_v0 }
 0x96f   : > { %2567 = vmatpush3.msra.mxu0 %v1666_v42 }
 0x970   : > { %v1664_v53 = vpop.permute.xlu0 %1663  ;;  %2568 = vmatprep.subr.mxu0 %v2986_v0 }
 0x971   : > { %2569 = vmatpush3.msra.mxu0 %v1664_v53 }
 0x972   : > { %2570 = vmatprep.subr.mxu0 %v2986_v0 }
 0x973   : > { %2571 = vmatpush3.msra.mxu0 %v1662_v14 }
 0x974   : > { %v1660_v37 = vpop.permute.xlu0 %1659  ;;  %2572 = vmatprep.subr.mxu0 %v2986_v0 }
 0x975   : > { %2573 = vmatpush3.msra.mxu0 %v1660_v37 }
 0x976   : > { %2574 = vmatprep.subr.mxu0 %v2986_v0 }
 0x977   : > { %2575 = vmatpush3.msra.mxu0 %v1658_v21 }
 0x978   : > { %v1656_v47 = vpop.permute.xlu0 %1655  ;;  %2576 = vmatprep.subr.mxu0 %v2986_v0 }
 0x979   : > { %2577 = vmatpush3.msra.mxu0 %v1656_v47 }
 0x97a   : > { %v2724_v54 = vpop.eup %2723  ;;  %2578 = vmatprep.subr.mxu0 %v2986_v0 }
 0x97b   : > { %1629 = vadd.xlane.f32.xlu1 %v2724_v54  ;;  %2579 = vmatpush3.msra.mxu0 %v1654_v25 }
 0x97c   : > { %v1652_v55 = vpop.permute.xlu0 %1651  ;;  %2580 = vmatprep.subr.mxu0 %v2986_v0 }
 0x97d   : > { %2581 = vmatpush3.msra.mxu0 %v1652_v55 }
 0x97e   : > { %2582 = vmatprep.subr.mxu0 %v2986_v0 }
 0x97f   : > { %2583 = vmatpush3.msra.mxu0 %v1650_v39 }
 0x980   : > { %v1648_v57 = vpop.permute.xlu0 %1647  ;;  %2584 = vmatprep.subr.mxu0 %v2986_v0 }
 0x981   : > { %2585 = vmatpush3.msra.mxu0 %v1648_v57 }
 0x982   : > { %2586 = vmatprep.subr.mxu0 %v2986_v0 }
 0x983   : > { %2587 = vmatpush3.msra.mxu0 %v1646_v56 }
 0x984   : > { %v1644_v58 = vpop.permute.xlu0 %1643  ;;  %2588 = vmatprep.subr.mxu0 %v2986_v0 }
 0x985   : > { %2589 = vmatpush3.msra.mxu0 %v1644_v58 }
 0x986   : > { %2590 = vmatprep.subr.mxu0 %v2986_v0 }
 0x987   : > { %2591 = vmatpush3.msra.mxu0 %v1642_v59 }
 0x988   : > { %v1640_v60 = vpop.permute.xlu0 %1639  ;;  %2592 = vmatprep.subr.mxu0 %v2986_v0 }
 0x989   : > { %2593 = vmatpush3.msra.mxu0 %v1640_v60 }
 0x98a   : > { %2594 = vmatprep.subr.mxu0 %v2986_v0 }
 0x98c   : > { %1637 = vrot.lane.b32.xlu1 %v2736_v61, %s2994_s15  ;;  %v1757_v10 = vpop.permute.xlu0 %1756  ;;  %s2877_s15 = scalar_lea.vmem %s2876_s23, 256 }
 0x98d   : > { %v1767_v24 = vsel %vm691_vm3, %v3551_v41, %v1757_v10  ;;  %p2879_p10 = scmp.lt.s32.totalorder %s2877_s15, %s2871_s11 }
 0x98f   : > { %p2880_p4 = por %p2879_p10, %p2878_p11 }
 0x990   : > { %1760 = vrot.lane.b32.xlu1 %v3798_v45, %s2996_s19 }
 0x991   : > { %p2881_p6 = pnand %p2880_p4, %p2874_p0 }
 0xa04   : > { %v1630_v13 = vpop.xlane.xlu1 %1629 }
 0xa05   : > { %2725 = vrcp.f32 %v1630_v13 }
 0xa08   : > { %v1638_v15 = vpop.permute.xlu1 %1637 }
 0xa09   : > { %2595 = vmatpush3.msra.mxu0 %v1638_v15 }
 0xa0a   : > { %2599 = vmatprep.subr.mxu0 %v2986_v0 }
 0xa0c   : > { %v1761_v11 = vpop.permute.xlu1 %1760 }
 0xa0d   : > { %v1769_v27 = vsel %vm1768_vm6, %v1767_v24, %v1761_v11 }
 0xa12   : > { %v2726_v17 = vpop.eup %2725 }
 0xa13   : > { %v1632_v62 = vmul.f32 %v2726_v17, %v1630_v13 }
 0xa15   : > { %v1633_v63 = vsub.f32 2.0, %v1632_v62 }
 0xa17   : > { %v1634_v1 = vmul.f32 %v2726_v17, %v1633_v63 }
 0xa19   : > { %v1635_v2 = vmul.f32 %v2724_v54, %v1634_v1 }
 0xa1b   : > { %v1636_v3 = vadd.f32 %v1635_v2, %v3751_v7  ;;  %2597 = vmatmul.mubr.f32.vlgmr.msra.gmra.mxu0 %v1635_v2  ;;  %v1772_v7 = vld [vmem:[#allocation11] sm:$0xff] }
 0xa1c   : > { %2607 = vmatprep.mubr.msk.f32.mxu0 %vm2987_vm1, %v2986_v0  ;;  %2600 = vmatpush3.msra.mxu0 %v1775_v4 }
 0xa1d   : > { %v1857_v40 = vmul.f32 0.25, %v1636_v3  ;;  %2601 = vmatprep.subr.mxu0 %v2986_v0 }
 0xa1e   : > { %2602 = vmatpush3.msra.mxu0 %v1774_v5 }
 0xa1f   : > { %1858 = vst [vmem:[%s468_s7] sm:$0xff] %v1857_v40  ;;  %2603 = vmatprep.subr.mxu0 %v2986_v0 }
 0xa20   : > { %2604 = vmatpush3.msra.mxu0 %v1773_v8 }
 0xa21   : > { %2605 = vmatprep.subr.mxu0 %v2986_v0 }
 0xa22   : > { %2606 = vmatpush3.msra.mxu0 %v1772_v7 }
 0xadb   : > { %v1751_v9 = vpop.f32.mrf.mxu0 }
 0xadc   : > { %1764 = vrot.lane.b32.xlu0 %v1751_v9, %s2997_s29 }
 0xadd   : > { %v2598_v6 = vpop.f32.mrf.mxu0 }
 0xb4e   : > { %v1765_v28 = vpop.permute.xlu0 %1764 }
 0xb4f   : > { %v1771_v0 = vsel %vm1770_vm7, %v1769_v27, %v1765_v28 }
 0xb50   : > { %2608 = vmatmul.mubr.msk.f32.vlgmr.msra.gmra.mxu0 %vm483_vm2, %v1771_v0 }
 0xb51   : > { %2884 = shalt.err (!%p2881_p6)
}
 0xb52   : > { %s2885_s27 = scalar_lea.hbm %s1889_s28, 128  ;;  %s2889_s29 = scalar_lea.hbm %s3917_s10, 256 }
 0xb53   : > { %p2886_p5 = scmp.ne.s32.totalorder %s1889_s28, %s2885_s27  ;;  %p2890_p3 = scmp.lt.s32.totalorder %s1889_s28, %s3917_s10 }
 0xb54   : > { %p2891_p7 = scmp.lt.s32.totalorder %s2889_s29, %s2885_s27 }
 0xb55   : > { %p2887_p8 = pnand %p2886_p5, %p3947_p9 }
 0xb56   : > { %p2892_p1 = por %p2891_p7, %p2890_p3 }
 0xb57   : > { %p2888_p2 = pneg %p2887_p8 }
 0xb59   : > { %p2893_p12 = pnand %p2892_p1, %p2888_p2 }
 0xb5b   : > { %2896 = shalt.err (!%p2893_p12)
}
 0xb5c   : > { %2627 = dma.vmem_to_hbm [thread:$0]  (%p3947_p9), %s1892_s2, 128, %s1889_s28, %s1865_s24   ;;  %v2136_v41 = vld [vmem:[%s3915_s8] ss:$0 sm:$0xff] }
 0xb5d   : > { %s461_s23 = scalar_lea.vmem [#allocation12], %s3238_s30  ;;  %s3869_s7 = scalar_lea.hbm %s3916_s9, %s2140_s22 }
 0xb5e   : > { %s1878_s15 = sshll.u32 %s461_s23, 4  ;;  %s1860_s29 = scalar_lea.sflag [#allocation5], %s3235_s4  ;;  %s1879_s15 = int_to_ptr.vmem [resolvable:$true] %s1878_s15 }
 0xb5f   : > { %s2897_s28 = scalar_lea.vmem %s1879_s15, 128  ;;  %s2999_s30 = smov [#allocation12]  }
 0xb60   : > { %p2898_p13 = scmp.ne.s32.totalorder %s1879_s15, %s2897_s28  ;;  %s2901_s2 = sshll.u32 %s2999_s30, 4  ;;  %s2902_s2 = int_to_ptr.vmem [resolvable:$false] %s2901_s2 }
 0xb61   : > { %s2903_s24 = scalar_lea.vmem %s2902_s2, 256  ;;  %p2904_p10 = scmp.lt.s32.totalorder %s1879_s15, %s2902_s2 }
 0xb62   : > { %p2899_p0 = pnand %p2898_p13, %p3947_p9  ;;  %p2905_p4 = scmp.lt.s32.totalorder %s2903_s24, %s2897_s28 }
 0xb64   : > { %p2900_p11 = pneg %p2899_p0  ;;  %p2906_p6 = por %p2905_p4, %p2904_p10 }
 0xb66   : > { %p2907_p5 = pnand %p2906_p6, %p2900_p11 }
 0xc10   : > { %v1852_v29 = vpop.f32.mrf.mxu0 }
 0xc11   : > { %v1853_v30 = vadd.f32 %v2136_v41, %v1852_v29 }
 0xc12   : > { %v2609_v31 = vpop.f32.mrf.mxu0 }
 0xc13   : > { %1856 = vst.msk [vmem:[%s461_s23] sm:$0xff] %vm483_vm2, %v1853_v30 }
 0xc14   : > { %2910 = shalt.err (!%p2907_p5)
}
 0xc15   : > { %s2911_s17 = scalar_lea.hbm %s3869_s7, 128  ;;  %s2915_s12 = scalar_lea.hbm %s3916_s9, 256 }
 0xc16   : > { %p2912_p8 = scmp.ne.s32.totalorder %s3869_s7, %s2911_s17  ;;  %p2916_p7 = scmp.lt.s32.totalorder %s3869_s7, %s3916_s9 }
 0xc17   : > { %p2917_p1 = scmp.lt.s32.totalorder %s2915_s12, %s2911_s17 }
 0xc18   : > { %p2913_p2 = pnand %p2912_p8, %p3947_p9 }
 0xc19   : > { %p2918_p12 = por %p2917_p1, %p2916_p7 }
 0xc1a   : > { %p2914_p3 = pneg %p2913_p2 }
 0xc1c   : > { %p2919_p13 = pnand %p2918_p12, %p2914_p3 }
 0xc1e   : > { %2922 = shalt.err (!%p2919_p13)
}
 0xc1f   : > { %2626 = dma.vmem_to_hbm [thread:$0]  (%p3947_p9), %s1879_s15, 128, %s3869_s7, %s1860_s29  }
 0xc20 PF: > { %s1903_s21 = sand.u32 1, %s2965_s13   ;;  %p3948_p0 = scmp.ne.s32.totalorder %s3930_s20, 0 }
 0xc21   : > { %p3949_p11 = scmp.ge.s32.totalorder %s2977_s16, 2  ;;  %s1904_s23 = scalar_lea.sflag [#allocation5], %s1903_s21 }
 0xc23   : > { %p2648_p10 = pnand %p3949_p11, %p3948_p0 }
 0xc25   : > { %p2649_p4 = pneg %p2648_p10 }
 0xc27   : > { %2956 = dma.done.wait (%p2649_p4), %s1904_s23, 128  }
 0xc28   : > { %2958 = vsyncadd (%p2649_p4), %s1904_s23, 4294967168  ;;  %s1913_s27 = scalar_lea.sflag [#allocation14], %s1903_s21 }
 0xc29   : > { %2960 = dma.done.wait (%p2649_p4), %s1913_s27, 128  }
 0xc2a   : > { %2962 = vsyncadd (%p2649_p4), %s1913_s27, 4294967168  ;;  %s3950_s25 = sld [smem:[#allocation21_spill]]  ;;  %p31_p9 = scmp.ge.s32.totalorder %s3144_s26, 4  }
 0xc2b   : > { %s3951_s15 = sld [smem:[#allocation22_spill]]  ;;  %s3952_s13 = smov %s2969_s14 }
 0xc2c   : > { %s3954_s16 = smov %s3144_s26  ;;  %33 = sbr.rel (!%p31_p9) target bundleno = 14 (0xe), region = 143 }
 0xc30   : > { %s3953_s14 = smov %s3950_s25 }
 0xc31   :  { %1918 = vsyncpa [#allocation4], 1 }
 0xc32   :  { %1920 = vsyncpa [#allocation4 + $0x1], 1 }
 0xc33   :  { %1921 = vsyncpa [#allocation7], 1 }
 0xc34   :  { %1923 = vsyncpa [#allocation7 + $0x1], 1 }
 0xc35   :  { %1924 = vsyncpa [#allocation10], 1 }
 0xc36   :  { %1925 = vsyncpa [#allocation5], 1 }
 0xc37   :  { %1927 = vsyncpa [#allocation5 + $0x1], 1 }
 0xc38   :  { %1928 = vsyncpa [#allocation14], 1 }
 0xc39   :  { %1930 = vsyncpa [#allocation14 + $0x1], 1 }

</bundles_post_ra>
